<compile_context>
chip_gen: v5e
topology: v5e:2x2
jax: 0.10.0
libtpu: 0.0.40
codegen_flags: <defaults>
</compile_context>

<pallas_src>
import functools

import jax
import jax.numpy as jnp
import numpy as np
from jax.experimental import pallas as pl
from jax.experimental.pallas import tpu as pltpu

# Set to jnp.bfloat16 on v6e/v7x to run the MXU matmuls with bf16 operands
# (f32 accumulation) for higher MXU peak; kept f32 here so the correctness
# check stays tight on every generation (v5e VPU/EUP have no bf16 anyway).
MXU_DTYPE = jnp.float32

# 3x3 taps, row-major: tap t corresponds to (dh, dw) = (t // 3 - 1, t % 3 - 1).
_TAPS = tuple((dh, dw) for dh in (-1, 0, 1) for dw in (-1, 0, 1))


def _shift_cols(x, d):
    """Circular shift along the last (lane) axis: y[:, p] = x[:, (p + d) % n].

    Positions whose source pixel falls outside the image are garbage here; the
    caller multiplies by the per-tap edge mask, which zeroes exactly those
    positions (including row-boundary wraps).  Implemented with two static
    slices + concat (pltpu.roll would also work; this keeps semantics obvious).
    """
    n = x.shape[-1]
    s = d % n
    if s == 0:
        return x
    return jnp.concatenate([x[:, s:], x[:, :s]], axis=1)


def _miniseg_fused_kernel(x_ref, masks_ref, *refs, img_w, n_layers):
    """Fused MiniSeg forward for one batch element.

    x_ref     : (1, Cin0, H*W)   input image, lane-dense
    masks_ref : (9, H*W)         0/1 edge-validity mask per 3x3 tap
    refs      : w1, b1, ..., wL, bL, o_ref, patch_ref
                wi        : (Couti, 9*Cini)  im2col-flattened weights
                bi        : (Couti, 1)
                o_ref     : (1, num_labels, H*W)
                patch_ref : (9*Cin_max, H*W) f32 VMEM scratch (im2col buffer)
    """
    o_ref = refs[2 * n_layers]
    patch_ref = refs[2 * n_layers + 1]

    masks = masks_ref[...]            # (9, H*W)
    act = x_ref[0, :, :]              # (Cin, H*W)
    hw = act.shape[-1]

    for layer in range(n_layers):
        w = refs[2 * layer][...]      # (Cout, 9*Cin)
        b = refs[2 * layer + 1][...]  # (Cout, 1)
        cin = act.shape[0]
        cout = w.shape[0]

        if cin == 1:
            # Depth-1 contraction: cheaper as 9 VPU broadcast FMAs than as an
            # MXU outer product.
            out = jnp.zeros((cout, hw), jnp.float32)
            for t, (dh, dw) in enumerate(_TAPS):
                s = _shift_cols(act, dh * img_w + dw) * masks[t:t + 1, :]
                out = out + w[:, t:t + 1] * s
        else:
            # im2col into VMEM scratch, then ONE MXU matmul with K = 9*Cin and
            # a lane-dense (Cout, H*W) result.
            for t, (dh, dw) in enumerate(_TAPS):
                s = _shift_cols(act, dh * img_w + dw) * masks[t:t + 1, :]
                patch_ref[t * cin:(t + 1) * cin, :] = s
            patches = patch_ref[0:9 * cin, :]
            out = jnp.dot(w.astype(MXU_DTYPE), patches.astype(MXU_DTYPE),
                          preferred_element_type=jnp.float32)

        out = out + b                      # single post-loop bias add
        if layer < n_layers - 1:
            out = jnp.maximum(out, 0.0)    # ReLU between layers
        act = out

    o_ref[0, :, :] = act                   # (num_labels, H*W): full-lane stores


def _make_tap_masks(H, W):
    """(9, H*W) 0/1 masks: mask[t, h*W+w] = 1 iff (h+dh, w+dw) is in-image."""
    hh, ww = np.meshgrid(np.arange(H), np.arange(W), indexing="ij")
    masks = np.zeros((len(_TAPS), H * W), np.float32)
    for t, (dh, dw) in enumerate(_TAPS):
        valid = ((hh + dh >= 0) & (hh + dh < H) &
                 (ww + dw >= 0) & (ww + dw < W))
        masks[t] = valid.reshape(-1).astype(np.float32)
    return jnp.asarray(masks)


def init_miniseg_params(key, in_ch, num_labels, hidden=(16, 32), ksize=3):
    """Deterministic He-style init for the inferred MiniSeg conv stack (HWIO)."""
    chans = (in_ch,) + tuple(hidden) + (num_labels,)
    params = []
    for i in range(len(chans) - 1):
        key, kw_, kb_ = jax.random.split(key, 3)
        cin, cout = chans[i], chans[i + 1]
        fan_in = cin * ksize * ksize
        w = jax.random.normal(kw_, (ksize, ksize, cin, cout), jnp.float32)
        w = w * jnp.sqrt(2.0 / fan_in)
        b = 0.01 * jax.random.normal(kb_, (cout,), jnp.float32)
        params.append((w, b))
    return params


def adv_sprelnet_forward(x_nchw, params):
    """AdvSpRelNet.forward(X) = MiniSeg(X).  NCHW float32 in, NCHW logits out."""
    N, cin0, H, W = x_nchw.shape
    HW = H * W
    n_layers = len(params)
    num_labels = params[-1][0].shape[-1]

    x_flat = x_nchw.reshape(N, cin0, HW)          # H*W (=256) on the lane axis
    masks = _make_tap_masks(H, W)                 # (9, H*W)

    # Flatten weights to (Cout, 9*Cin) with tap-major / cin-minor columns,
    # matching the im2col patch-row order used in the kernel.
    flat_params = []
    for (w, b) in params:
        kh, kw, cin, cout = w.shape
        w_mat = jnp.transpose(w, (3, 0, 1, 2)).reshape(cout, kh * kw * cin)
        flat_params += [w_mat, b.reshape(cout, 1)]

    k_max = 9 * max(w.shape[2] for (w, _) in params)

    in_specs = [
        pl.BlockSpec((1, cin0, HW), lambda n: (n, 0, 0)),   # one image / step
        pl.BlockSpec(masks.shape, lambda n: (0, 0)),        # resident
    ]
    in_specs += [pl.BlockSpec(p.shape, lambda n: (0, 0)) for p in flat_params]

    out = pl.pallas_call(
        functools.partial(_miniseg_fused_kernel, img_w=W, n_layers=n_layers),
        out_shape=jax.ShapeDtypeStruct((N, num_labels, HW), jnp.float32),
        grid=(N,),
        in_specs=in_specs,
        out_specs=pl.BlockSpec((1, num_labels, HW), lambda n: (n, 0, 0)),
        scratch_shapes=[pltpu.VMEM((k_max, HW), jnp.float32)],
        compiler_params=pltpu.CompilerParams(
            # Batch axis is parallel -> v7x megacore shards it across both TCs.
            dimension_semantics=("parallel",),
        ),
    )(x_flat, masks, *flat_params)

    return out.reshape(N, num_labels, H, W)


def _reference_forward(x_nchw, params):
    """Pure-JAX reference (XLA conv) for correctness checking."""
    x = jnp.transpose(x_nchw, (0, 2, 3, 1))
    n_layers = len(params)
    for i, (w, b) in enumerate(params):
        x = jax.lax.conv_general_dilated(
            x, w, window_strides=(1, 1), padding="SAME",
            dimension_numbers=("NHWC", "HWIO", "NHWC"),
        ) + b
        if i < n_layers - 1:
            x = jnp.maximum(x, 0.0)
    return jnp.transpose(x, (0, 3, 1, 2))


if __name__ == "__main__":
    key = jax.random.PRNGKey(0)
    k_x, k_p = jax.random.split(key)

    batch, in_ch, H, W = 2, 1, 16, 16
    num_labels = 4

    x = jax.random.normal(k_x, (batch, in_ch, H, W), jnp.float32)  # NCHW
    params = init_miniseg_params(k_p, in_ch, num_labels)

    fwd = jax.jit(adv_sprelnet_forward)
    out = jax.block_until_ready(fwd(x, params))
    assert out.shape == (batch, num_labels, H, W), out.shape

    ref = jax.block_until_ready(_reference_forward(x, params))
    np.testing.assert_allclose(np.asarray(out), np.asarray(ref),
                               rtol=1e-3, atol=1e-3)

    print("KERNEL_OK")
</pallas_src>

<mosaic_0001>
module attributes {stable_mosaic.version = 11 : i64} {
  func.func @_miniseg_fused_kernel(%arg0: i32, %arg1: memref<1x1x256xf32, #tpu.memory_space<vmem>>, %arg2: memref<9x256xf32, #tpu.memory_space<vmem>>, %arg3: memref<16x9xf32, #tpu.memory_space<vmem>>, %arg4: memref<16x1xf32, #tpu.memory_space<vmem>>, %arg5: memref<32x144xf32, #tpu.memory_space<vmem>>, %arg6: memref<32x1xf32, #tpu.memory_space<vmem>>, %arg7: memref<4x288xf32, #tpu.memory_space<vmem>>, %arg8: memref<4x1xf32, #tpu.memory_space<vmem>>, %arg9: memref<1x4x256xf32, #tpu.memory_space<vmem>>, %arg10: memref<288x256xf32, #tpu.memory_space<vmem>>) attributes {dimension_semantics = [#tpu.dimension_semantics<parallel>], iteration_bounds = array<i64: 2>, scalar_prefetch = 0 : i64, scratch_operands = 1 : i64, tpu.core_type = #tpu.core_type<tc>, window_params = [{transform_indices = @transform_0, window_bounds = array<i64: 1, 1, 256>}, {pipeline_mode = #tpu.pipeline_mode<synchronous>, transform_indices = @transform_1, window_bounds = array<i64: 9, 256>}, {pipeline_mode = #tpu.pipeline_mode<synchronous>, transform_indices = @transform_2, window_bounds = array<i64: 16, 9>}, {pipeline_mode = #tpu.pipeline_mode<synchronous>, transform_indices = @transform_3, window_bounds = array<i64: 16, 1>}, {pipeline_mode = #tpu.pipeline_mode<synchronous>, transform_indices = @transform_4, window_bounds = array<i64: 32, 144>}, {pipeline_mode = #tpu.pipeline_mode<synchronous>, transform_indices = @transform_5, window_bounds = array<i64: 32, 1>}, {pipeline_mode = #tpu.pipeline_mode<synchronous>, transform_indices = @transform_6, window_bounds = array<i64: 4, 288>}, {pipeline_mode = #tpu.pipeline_mode<synchronous>, transform_indices = @transform_7, window_bounds = array<i64: 4, 1>}, {transform_indices = @transform_8, window_bounds = array<i64: 1, 4, 256>}]} {
    %c0 = arith.constant 0 : index
    %c0_0 = arith.constant 0 : index
    %0 = vector.load %arg2[%c0, %c0_0] : memref<9x256xf32, #tpu.memory_space<vmem>>, vector<9x256xf32>
    %c0_1 = arith.constant 0 : index
    %c0_2 = arith.constant 0 : index
    %c0_3 = arith.constant 0 : index
    %1 = vector.load %arg1[%c0_1, %c0_2, %c0_3] : memref<1x1x256xf32, #tpu.memory_space<vmem>>, vector<1x1x256xf32>
    %2 = vector.shape_cast %1 : vector<1x1x256xf32> to vector<1x256xf32>
    %c0_4 = arith.constant 0 : index
    %c0_5 = arith.constant 0 : index
    %3 = vector.load %arg3[%c0_4, %c0_5] : memref<16x9xf32, #tpu.memory_space<vmem>>, vector<16x9xf32>
    %c0_6 = arith.constant 0 : index
    %c0_7 = arith.constant 0 : index
    %4 = vector.load %arg4[%c0_6, %c0_7] : memref<16x1xf32, #tpu.memory_space<vmem>>, vector<16x1xf32>
    %cst = arith.constant 0.000000e+00 : f32
    %5 = vector.broadcast %cst : f32 to vector<16x256xf32>
    %6 = vector.extract_strided_slice %2 {offsets = [0, 239], sizes = [1, 17], strides = [1, 1]} : vector<1x256xf32> to vector<1x17xf32>
    %7 = vector.extract_strided_slice %2 {offsets = [0, 0], sizes = [1, 239], strides = [1, 1]} : vector<1x256xf32> to vector<1x239xf32>
    %8 = tpu.concatenate %6, %7 in 1 : vector<1x17xf32>, vector<1x239xf32> -> vector<1x256xf32>
    %9 = vector.extract_strided_slice %0 {offsets = [0, 0], sizes = [1, 256], strides = [1, 1]} : vector<9x256xf32> to vector<1x256xf32>
    %10 = arith.mulf %8, %9 : vector<1x256xf32>
    %11 = vector.extract_strided_slice %3 {offsets = [0, 0], sizes = [16, 1], strides = [1, 1]} : vector<16x9xf32> to vector<16x1xf32>
    %12 = vector.broadcast %11 : vector<16x1xf32> to vector<16x256xf32>
    %13 = vector.broadcast %10 : vector<1x256xf32> to vector<16x256xf32>
    %14 = arith.mulf %12, %13 : vector<16x256xf32>
    %15 = arith.addf %5, %14 : vector<16x256xf32>
    %16 = vector.extract_strided_slice %2 {offsets = [0, 240], sizes = [1, 16], strides = [1, 1]} : vector<1x256xf32> to vector<1x16xf32>
    %17 = vector.extract_strided_slice %2 {offsets = [0, 0], sizes = [1, 240], strides = [1, 1]} : vector<1x256xf32> to vector<1x240xf32>
    %18 = tpu.concatenate %16, %17 in 1 : vector<1x16xf32>, vector<1x240xf32> -> vector<1x256xf32>
    %19 = vector.extract_strided_slice %0 {offsets = [1, 0], sizes = [1, 256], strides = [1, 1]} : vector<9x256xf32> to vector<1x256xf32>
    %20 = arith.mulf %18, %19 : vector<1x256xf32>
    %21 = vector.extract_strided_slice %3 {offsets = [0, 1], sizes = [16, 1], strides = [1, 1]} : vector<16x9xf32> to vector<16x1xf32>
    %22 = vector.broadcast %21 : vector<16x1xf32> to vector<16x256xf32>
    %23 = vector.broadcast %20 : vector<1x256xf32> to vector<16x256xf32>
    %24 = arith.mulf %22, %23 : vector<16x256xf32>
    %25 = arith.addf %15, %24 : vector<16x256xf32>
    %26 = vector.extract_strided_slice %2 {offsets = [0, 241], sizes = [1, 15], strides = [1, 1]} : vector<1x256xf32> to vector<1x15xf32>
    %27 = vector.extract_strided_slice %2 {offsets = [0, 0], sizes = [1, 241], strides = [1, 1]} : vector<1x256xf32> to vector<1x241xf32>
    %28 = tpu.concatenate %26, %27 in 1 : vector<1x15xf32>, vector<1x241xf32> -> vector<1x256xf32>
    %29 = vector.extract_strided_slice %0 {offsets = [2, 0], sizes = [1, 256], strides = [1, 1]} : vector<9x256xf32> to vector<1x256xf32>
    %30 = arith.mulf %28, %29 : vector<1x256xf32>
    %31 = vector.extract_strided_slice %3 {offsets = [0, 2], sizes = [16, 1], strides = [1, 1]} : vector<16x9xf32> to vector<16x1xf32>
    %32 = vector.broadcast %31 : vector<16x1xf32> to vector<16x256xf32>
    %33 = vector.broadcast %30 : vector<1x256xf32> to vector<16x256xf32>
    %34 = arith.mulf %32, %33 : vector<16x256xf32>
    %35 = arith.addf %25, %34 : vector<16x256xf32>
    %36 = vector.extract_strided_slice %2 {offsets = [0, 255], sizes = [1, 1], strides = [1, 1]} : vector<1x256xf32> to vector<1x1xf32>
    %37 = vector.extract_strided_slice %2 {offsets = [0, 0], sizes = [1, 255], strides = [1, 1]} : vector<1x256xf32> to vector<1x255xf32>
    %38 = tpu.concatenate %36, %37 in 1 : vector<1x1xf32>, vector<1x255xf32> -> vector<1x256xf32>
    %39 = vector.extract_strided_slice %0 {offsets = [3, 0], sizes = [1, 256], strides = [1, 1]} : vector<9x256xf32> to vector<1x256xf32>
    %40 = arith.mulf %38, %39 : vector<1x256xf32>
    %41 = vector.extract_strided_slice %3 {offsets = [0, 3], sizes = [16, 1], strides = [1, 1]} : vector<16x9xf32> to vector<16x1xf32>
    %42 = vector.broadcast %41 : vector<16x1xf32> to vector<16x256xf32>
    %43 = vector.broadcast %40 : vector<1x256xf32> to vector<16x256xf32>
    %44 = arith.mulf %42, %43 : vector<16x256xf32>
    %45 = arith.addf %35, %44 : vector<16x256xf32>
    %46 = vector.extract_strided_slice %0 {offsets = [4, 0], sizes = [1, 256], strides = [1, 1]} : vector<9x256xf32> to vector<1x256xf32>
    %47 = arith.mulf %2, %46 : vector<1x256xf32>
    %48 = vector.extract_strided_slice %3 {offsets = [0, 4], sizes = [16, 1], strides = [1, 1]} : vector<16x9xf32> to vector<16x1xf32>
    %49 = vector.broadcast %48 : vector<16x1xf32> to vector<16x256xf32>
    %50 = vector.broadcast %47 : vector<1x256xf32> to vector<16x256xf32>
    %51 = arith.mulf %49, %50 : vector<16x256xf32>
    %52 = arith.addf %45, %51 : vector<16x256xf32>
    %53 = vector.extract_strided_slice %2 {offsets = [0, 1], sizes = [1, 255], strides = [1, 1]} : vector<1x256xf32> to vector<1x255xf32>
    %54 = vector.extract_strided_slice %2 {offsets = [0, 0], sizes = [1, 1], strides = [1, 1]} : vector<1x256xf32> to vector<1x1xf32>
    %55 = tpu.concatenate %53, %54 in 1 : vector<1x255xf32>, vector<1x1xf32> -> vector<1x256xf32>
    %56 = vector.extract_strided_slice %0 {offsets = [5, 0], sizes = [1, 256], strides = [1, 1]} : vector<9x256xf32> to vector<1x256xf32>
    %57 = arith.mulf %55, %56 : vector<1x256xf32>
    %58 = vector.extract_strided_slice %3 {offsets = [0, 5], sizes = [16, 1], strides = [1, 1]} : vector<16x9xf32> to vector<16x1xf32>
    %59 = vector.broadcast %58 : vector<16x1xf32> to vector<16x256xf32>
    %60 = vector.broadcast %57 : vector<1x256xf32> to vector<16x256xf32>
    %61 = arith.mulf %59, %60 : vector<16x256xf32>
    %62 = arith.addf %52, %61 : vector<16x256xf32>
    %63 = vector.extract_strided_slice %2 {offsets = [0, 15], sizes = [1, 241], strides = [1, 1]} : vector<1x256xf32> to vector<1x241xf32>
    %64 = vector.extract_strided_slice %2 {offsets = [0, 0], sizes = [1, 15], strides = [1, 1]} : vector<1x256xf32> to vector<1x15xf32>
    %65 = tpu.concatenate %63, %64 in 1 : vector<1x241xf32>, vector<1x15xf32> -> vector<1x256xf32>
    %66 = vector.extract_strided_slice %0 {offsets = [6, 0], sizes = [1, 256], strides = [1, 1]} : vector<9x256xf32> to vector<1x256xf32>
    %67 = arith.mulf %65, %66 : vector<1x256xf32>
    %68 = vector.extract_strided_slice %3 {offsets = [0, 6], sizes = [16, 1], strides = [1, 1]} : vector<16x9xf32> to vector<16x1xf32>
    %69 = vector.broadcast %68 : vector<16x1xf32> to vector<16x256xf32>
    %70 = vector.broadcast %67 : vector<1x256xf32> to vector<16x256xf32>
    %71 = arith.mulf %69, %70 : vector<16x256xf32>
    %72 = arith.addf %62, %71 : vector<16x256xf32>
    %73 = vector.extract_strided_slice %2 {offsets = [0, 16], sizes = [1, 240], strides = [1, 1]} : vector<1x256xf32> to vector<1x240xf32>
    %74 = vector.extract_strided_slice %2 {offsets = [0, 0], sizes = [1, 16], strides = [1, 1]} : vector<1x256xf32> to vector<1x16xf32>
    %75 = tpu.concatenate %73, %74 in 1 : vector<1x240xf32>, vector<1x16xf32> -> vector<1x256xf32>
    %76 = vector.extract_strided_slice %0 {offsets = [7, 0], sizes = [1, 256], strides = [1, 1]} : vector<9x256xf32> to vector<1x256xf32>
    %77 = arith.mulf %75, %76 : vector<1x256xf32>
    %78 = vector.extract_strided_slice %3 {offsets = [0, 7], sizes = [16, 1], strides = [1, 1]} : vector<16x9xf32> to vector<16x1xf32>
    %79 = vector.broadcast %78 : vector<16x1xf32> to vector<16x256xf32>
    %80 = vector.broadcast %77 : vector<1x256xf32> to vector<16x256xf32>
    %81 = arith.mulf %79, %80 : vector<16x256xf32>
    %82 = arith.addf %72, %81 : vector<16x256xf32>
    %83 = vector.extract_strided_slice %2 {offsets = [0, 17], sizes = [1, 239], strides = [1, 1]} : vector<1x256xf32> to vector<1x239xf32>
    %84 = vector.extract_strided_slice %2 {offsets = [0, 0], sizes = [1, 17], strides = [1, 1]} : vector<1x256xf32> to vector<1x17xf32>
    %85 = tpu.concatenate %83, %84 in 1 : vector<1x239xf32>, vector<1x17xf32> -> vector<1x256xf32>
    %86 = vector.extract_strided_slice %0 {offsets = [8, 0], sizes = [1, 256], strides = [1, 1]} : vector<9x256xf32> to vector<1x256xf32>
    %87 = arith.mulf %85, %86 : vector<1x256xf32>
    %88 = vector.extract_strided_slice %3 {offsets = [0, 8], sizes = [16, 1], strides = [1, 1]} : vector<16x9xf32> to vector<16x1xf32>
    %89 = vector.broadcast %88 : vector<16x1xf32> to vector<16x256xf32>
    %90 = vector.broadcast %87 : vector<1x256xf32> to vector<16x256xf32>
    %91 = arith.mulf %89, %90 : vector<16x256xf32>
    %92 = arith.addf %82, %91 : vector<16x256xf32>
    %93 = vector.broadcast %4 : vector<16x1xf32> to vector<16x256xf32>
    %94 = arith.addf %92, %93 : vector<16x256xf32>
    %cst_8 = arith.constant 0.000000e+00 : f32
    %95 = vector.broadcast %cst_8 : f32 to vector<16x256xf32>
    %96 = arith.maximumf %94, %95 : vector<16x256xf32>
    %c0_9 = arith.constant 0 : index
    %c0_10 = arith.constant 0 : index
    %97 = vector.load %arg5[%c0_9, %c0_10] : memref<32x144xf32, #tpu.memory_space<vmem>>, vector<32x144xf32>
    %c0_11 = arith.constant 0 : index
    %c0_12 = arith.constant 0 : index
    %98 = vector.load %arg6[%c0_11, %c0_12] : memref<32x1xf32, #tpu.memory_space<vmem>>, vector<32x1xf32>
    %99 = vector.extract_strided_slice %96 {offsets = [0, 239], sizes = [16, 17], strides = [1, 1]} : vector<16x256xf32> to vector<16x17xf32>
    %100 = vector.extract_strided_slice %96 {offsets = [0, 0], sizes = [16, 239], strides = [1, 1]} : vector<16x256xf32> to vector<16x239xf32>
    %101 = tpu.concatenate %99, %100 in 1 : vector<16x17xf32>, vector<16x239xf32> -> vector<16x256xf32>
    %102 = vector.extract_strided_slice %0 {offsets = [0, 0], sizes = [1, 256], strides = [1, 1]} : vector<9x256xf32> to vector<1x256xf32>
    %103 = vector.broadcast %102 : vector<1x256xf32> to vector<16x256xf32>
    %104 = arith.mulf %101, %103 : vector<16x256xf32>
    %c0_13 = arith.constant 0 : index
    %c0_14 = arith.constant 0 : index
    %105 = vector.load %arg10[%c0_13, %c0_14] : memref<288x256xf32, #tpu.memory_space<vmem>>, vector<16x256xf32>
    tpu.vector_store %arg10[%c0_13, %c0_14], %104 {strides = array<i32>} : memref<288x256xf32, #tpu.memory_space<vmem>>, vector<16x256xf32>,
    %106 = vector.extract_strided_slice %96 {offsets = [0, 240], sizes = [16, 16], strides = [1, 1]} : vector<16x256xf32> to vector<16x16xf32>
    %107 = vector.extract_strided_slice %96 {offsets = [0, 0], sizes = [16, 240], strides = [1, 1]} : vector<16x256xf32> to vector<16x240xf32>
    %108 = tpu.concatenate %106, %107 in 1 : vector<16x16xf32>, vector<16x240xf32> -> vector<16x256xf32>
    %109 = vector.extract_strided_slice %0 {offsets = [1, 0], sizes = [1, 256], strides = [1, 1]} : vector<9x256xf32> to vector<1x256xf32>
    %110 = vector.broadcast %109 : vector<1x256xf32> to vector<16x256xf32>
    %111 = arith.mulf %108, %110 : vector<16x256xf32>
    %c16 = arith.constant 16 : index
    %c0_15 = arith.constant 0 : index
    %112 = vector.load %arg10[%c16, %c0_15] : memref<288x256xf32, #tpu.memory_space<vmem>>, vector<16x256xf32>
    tpu.vector_store %arg10[%c16, %c0_15], %111 {strides = array<i32>} : memref<288x256xf32, #tpu.memory_space<vmem>>, vector<16x256xf32>,
    %113 = vector.extract_strided_slice %96 {offsets = [0, 241], sizes = [16, 15], strides = [1, 1]} : vector<16x256xf32> to vector<16x15xf32>
    %114 = vector.extract_strided_slice %96 {offsets = [0, 0], sizes = [16, 241], strides = [1, 1]} : vector<16x256xf32> to vector<16x241xf32>
    %115 = tpu.concatenate %113, %114 in 1 : vector<16x15xf32>, vector<16x241xf32> -> vector<16x256xf32>
    %116 = vector.extract_strided_slice %0 {offsets = [2, 0], sizes = [1, 256], strides = [1, 1]} : vector<9x256xf32> to vector<1x256xf32>
    %117 = vector.broadcast %116 : vector<1x256xf32> to vector<16x256xf32>
    %118 = arith.mulf %115, %117 : vector<16x256xf32>
    %c32 = arith.constant 32 : index
    %c0_16 = arith.constant 0 : index
    %119 = vector.load %arg10[%c32, %c0_16] : memref<288x256xf32, #tpu.memory_space<vmem>>, vector<16x256xf32>
    tpu.vector_store %arg10[%c32, %c0_16], %118 {strides = array<i32>} : memref<288x256xf32, #tpu.memory_space<vmem>>, vector<16x256xf32>,
    %120 = vector.extract_strided_slice %96 {offsets = [0, 255], sizes = [16, 1], strides = [1, 1]} : vector<16x256xf32> to vector<16x1xf32>
    %121 = vector.extract_strided_slice %96 {offsets = [0, 0], sizes = [16, 255], strides = [1, 1]} : vector<16x256xf32> to vector<16x255xf32>
    %122 = tpu.concatenate %120, %121 in 1 : vector<16x1xf32>, vector<16x255xf32> -> vector<16x256xf32>
    %123 = vector.extract_strided_slice %0 {offsets = [3, 0], sizes = [1, 256], strides = [1, 1]} : vector<9x256xf32> to vector<1x256xf32>
    %124 = vector.broadcast %123 : vector<1x256xf32> to vector<16x256xf32>
    %125 = arith.mulf %122, %124 : vector<16x256xf32>
    %c48 = arith.constant 48 : index
    %c0_17 = arith.constant 0 : index
    %126 = vector.load %arg10[%c48, %c0_17] : memref<288x256xf32, #tpu.memory_space<vmem>>, vector<16x256xf32>
    tpu.vector_store %arg10[%c48, %c0_17], %125 {strides = array<i32>} : memref<288x256xf32, #tpu.memory_space<vmem>>, vector<16x256xf32>,
    %127 = vector.extract_strided_slice %0 {offsets = [4, 0], sizes = [1, 256], strides = [1, 1]} : vector<9x256xf32> to vector<1x256xf32>
    %128 = vector.broadcast %127 : vector<1x256xf32> to vector<16x256xf32>
    %129 = arith.mulf %96, %128 : vector<16x256xf32>
    %c64 = arith.constant 64 : index
    %c0_18 = arith.constant 0 : index
    %130 = vector.load %arg10[%c64, %c0_18] : memref<288x256xf32, #tpu.memory_space<vmem>>, vector<16x256xf32>
    tpu.vector_store %arg10[%c64, %c0_18], %129 {strides = array<i32>} : memref<288x256xf32, #tpu.memory_space<vmem>>, vector<16x256xf32>,
    %131 = vector.extract_strided_slice %96 {offsets = [0, 1], sizes = [16, 255], strides = [1, 1]} : vector<16x256xf32> to vector<16x255xf32>
    %132 = vector.extract_strided_slice %96 {offsets = [0, 0], sizes = [16, 1], strides = [1, 1]} : vector<16x256xf32> to vector<16x1xf32>
    %133 = tpu.concatenate %131, %132 in 1 : vector<16x255xf32>, vector<16x1xf32> -> vector<16x256xf32>
    %134 = vector.extract_strided_slice %0 {offsets = [5, 0], sizes = [1, 256], strides = [1, 1]} : vector<9x256xf32> to vector<1x256xf32>
    %135 = vector.broadcast %134 : vector<1x256xf32> to vector<16x256xf32>
    %136 = arith.mulf %133, %135 : vector<16x256xf32>
    %c80 = arith.constant 80 : index
    %c0_19 = arith.constant 0 : index
    %137 = vector.load %arg10[%c80, %c0_19] : memref<288x256xf32, #tpu.memory_space<vmem>>, vector<16x256xf32>
    tpu.vector_store %arg10[%c80, %c0_19], %136 {strides = array<i32>} : memref<288x256xf32, #tpu.memory_space<vmem>>, vector<16x256xf32>,
    %138 = vector.extract_strided_slice %96 {offsets = [0, 15], sizes = [16, 241], strides = [1, 1]} : vector<16x256xf32> to vector<16x241xf32>
    %139 = vector.extract_strided_slice %96 {offsets = [0, 0], sizes = [16, 15], strides = [1, 1]} : vector<16x256xf32> to vector<16x15xf32>
    %140 = tpu.concatenate %138, %139 in 1 : vector<16x241xf32>, vector<16x15xf32> -> vector<16x256xf32>
    %141 = vector.extract_strided_slice %0 {offsets = [6, 0], sizes = [1, 256], strides = [1, 1]} : vector<9x256xf32> to vector<1x256xf32>
    %142 = vector.broadcast %141 : vector<1x256xf32> to vector<16x256xf32>
    %143 = arith.mulf %140, %142 : vector<16x256xf32>
    %c96 = arith.constant 96 : index
    %c0_20 = arith.constant 0 : index
    %144 = vector.load %arg10[%c96, %c0_20] : memref<288x256xf32, #tpu.memory_space<vmem>>, vector<16x256xf32>
    tpu.vector_store %arg10[%c96, %c0_20], %143 {strides = array<i32>} : memref<288x256xf32, #tpu.memory_space<vmem>>, vector<16x256xf32>,
    %145 = vector.extract_strided_slice %96 {offsets = [0, 16], sizes = [16, 240], strides = [1, 1]} : vector<16x256xf32> to vector<16x240xf32>
    %146 = vector.extract_strided_slice %96 {offsets = [0, 0], sizes = [16, 16], strides = [1, 1]} : vector<16x256xf32> to vector<16x16xf32>
    %147 = tpu.concatenate %145, %146 in 1 : vector<16x240xf32>, vector<16x16xf32> -> vector<16x256xf32>
    %148 = vector.extract_strided_slice %0 {offsets = [7, 0], sizes = [1, 256], strides = [1, 1]} : vector<9x256xf32> to vector<1x256xf32>
    %149 = vector.broadcast %148 : vector<1x256xf32> to vector<16x256xf32>
    %150 = arith.mulf %147, %149 : vector<16x256xf32>
    %c112 = arith.constant 112 : index
    %c0_21 = arith.constant 0 : index
    %151 = vector.load %arg10[%c112, %c0_21] : memref<288x256xf32, #tpu.memory_space<vmem>>, vector<16x256xf32>
    tpu.vector_store %arg10[%c112, %c0_21], %150 {strides = array<i32>} : memref<288x256xf32, #tpu.memory_space<vmem>>, vector<16x256xf32>,
    %152 = vector.extract_strided_slice %96 {offsets = [0, 17], sizes = [16, 239], strides = [1, 1]} : vector<16x256xf32> to vector<16x239xf32>
    %153 = vector.extract_strided_slice %96 {offsets = [0, 0], sizes = [16, 17], strides = [1, 1]} : vector<16x256xf32> to vector<16x17xf32>
    %154 = tpu.concatenate %152, %153 in 1 : vector<16x239xf32>, vector<16x17xf32> -> vector<16x256xf32>
    %155 = vector.extract_strided_slice %0 {offsets = [8, 0], sizes = [1, 256], strides = [1, 1]} : vector<9x256xf32> to vector<1x256xf32>
    %156 = vector.broadcast %155 : vector<1x256xf32> to vector<16x256xf32>
    %157 = arith.mulf %154, %156 : vector<16x256xf32>
    %c128 = arith.constant 128 : index
    %c0_22 = arith.constant 0 : index
    %158 = vector.load %arg10[%c128, %c0_22] : memref<288x256xf32, #tpu.memory_space<vmem>>, vector<16x256xf32>
    tpu.vector_store %arg10[%c128, %c0_22], %157 {strides = array<i32>} : memref<288x256xf32, #tpu.memory_space<vmem>>, vector<16x256xf32>,
    %c0_23 = arith.constant 0 : index
    %c0_24 = arith.constant 0 : index
    %159 = vector.load %arg10[%c0_23, %c0_24] : memref<288x256xf32, #tpu.memory_space<vmem>>, vector<144x256xf32>
    %cst_25 = arith.constant dense<0.000000e+00> : vector<32x256xf32>
    %160 = tpu.matmul %97, %159, %cst_25 {dimension_numbers = #tpu.dot_dimension_numbers<[1], [0], [0], [1], [0, 0, 1, 1], [], []>} : vector<32x144xf32>, vector<144x256xf32>, vector<32x256xf32> -> vector<32x256xf32>
    %161 = vector.broadcast %98 : vector<32x1xf32> to vector<32x256xf32>
    %162 = arith.addf %160, %161 : vector<32x256xf32>
    %cst_26 = arith.constant 0.000000e+00 : f32
    %163 = vector.broadcast %cst_26 : f32 to vector<32x256xf32>
    %164 = arith.maximumf %162, %163 : vector<32x256xf32>
    %c0_27 = arith.constant 0 : index
    %c0_28 = arith.constant 0 : index
    %165 = vector.load %arg7[%c0_27, %c0_28] : memref<4x288xf32, #tpu.memory_space<vmem>>, vector<4x288xf32>
    %c0_29 = arith.constant 0 : index
    %c0_30 = arith.constant 0 : index
    %166 = vector.load %arg8[%c0_29, %c0_30] : memref<4x1xf32, #tpu.memory_space<vmem>>, vector<4x1xf32>
    %167 = vector.extract_strided_slice %164 {offsets = [0, 239], sizes = [32, 17], strides = [1, 1]} : vector<32x256xf32> to vector<32x17xf32>
    %168 = vector.extract_strided_slice %164 {offsets = [0, 0], sizes = [32, 239], strides = [1, 1]} : vector<32x256xf32> to vector<32x239xf32>
    %169 = tpu.concatenate %167, %168 in 1 : vector<32x17xf32>, vector<32x239xf32> -> vector<32x256xf32>
    %170 = vector.extract_strided_slice %0 {offsets = [0, 0], sizes = [1, 256], strides = [1, 1]} : vector<9x256xf32> to vector<1x256xf32>
    %171 = vector.broadcast %170 : vector<1x256xf32> to vector<32x256xf32>
    %172 = arith.mulf %169, %171 : vector<32x256xf32>
    %c0_31 = arith.constant 0 : index
    %c0_32 = arith.constant 0 : index
    %173 = vector.load %arg10[%c0_31, %c0_32] : memref<288x256xf32, #tpu.memory_space<vmem>>, vector<32x256xf32>
    tpu.vector_store %arg10[%c0_31, %c0_32], %172 {strides = array<i32>} : memref<288x256xf32, #tpu.memory_space<vmem>>, vector<32x256xf32>,
    %174 = vector.extract_strided_slice %164 {offsets = [0, 240], sizes = [32, 16], strides = [1, 1]} : vector<32x256xf32> to vector<32x16xf32>
    %175 = vector.extract_strided_slice %164 {offsets = [0, 0], sizes = [32, 240], strides = [1, 1]} : vector<32x256xf32> to vector<32x240xf32>
    %176 = tpu.concatenate %174, %175 in 1 : vector<32x16xf32>, vector<32x240xf32> -> vector<32x256xf32>
    %177 = vector.extract_strided_slice %0 {offsets = [1, 0], sizes = [1, 256], strides = [1, 1]} : vector<9x256xf32> to vector<1x256xf32>
    %178 = vector.broadcast %177 : vector<1x256xf32> to vector<32x256xf32>
    %179 = arith.mulf %176, %178 : vector<32x256xf32>
    %c32_33 = arith.constant 32 : index
    %c0_34 = arith.constant 0 : index
    %180 = vector.load %arg10[%c32_33, %c0_34] : memref<288x256xf32, #tpu.memory_space<vmem>>, vector<32x256xf32>
    tpu.vector_store %arg10[%c32_33, %c0_34], %179 {strides = array<i32>} : memref<288x256xf32, #tpu.memory_space<vmem>>, vector<32x256xf32>,
    %181 = vector.extract_strided_slice %164 {offsets = [0, 241], sizes = [32, 15], strides = [1, 1]} : vector<32x256xf32> to vector<32x15xf32>
    %182 = vector.extract_strided_slice %164 {offsets = [0, 0], sizes = [32, 241], strides = [1, 1]} : vector<32x256xf32> to vector<32x241xf32>
    %183 = tpu.concatenate %181, %182 in 1 : vector<32x15xf32>, vector<32x241xf32> -> vector<32x256xf32>
    %184 = vector.extract_strided_slice %0 {offsets = [2, 0], sizes = [1, 256], strides = [1, 1]} : vector<9x256xf32> to vector<1x256xf32>
    %185 = vector.broadcast %184 : vector<1x256xf32> to vector<32x256xf32>
    %186 = arith.mulf %183, %185 : vector<32x256xf32>
    %c64_35 = arith.constant 64 : index
    %c0_36 = arith.constant 0 : index
    %187 = vector.load %arg10[%c64_35, %c0_36] : memref<288x256xf32, #tpu.memory_space<vmem>>, vector<32x256xf32>
    tpu.vector_store %arg10[%c64_35, %c0_36], %186 {strides = array<i32>} : memref<288x256xf32, #tpu.memory_space<vmem>>, vector<32x256xf32>,
    %188 = vector.extract_strided_slice %164 {offsets = [0, 255], sizes = [32, 1], strides = [1, 1]} : vector<32x256xf32> to vector<32x1xf32>
    %189 = vector.extract_strided_slice %164 {offsets = [0, 0], sizes = [32, 255], strides = [1, 1]} : vector<32x256xf32> to vector<32x255xf32>
    %190 = tpu.concatenate %188, %189 in 1 : vector<32x1xf32>, vector<32x255xf32> -> vector<32x256xf32>
    %191 = vector.extract_strided_slice %0 {offsets = [3, 0], sizes = [1, 256], strides = [1, 1]} : vector<9x256xf32> to vector<1x256xf32>
    %192 = vector.broadcast %191 : vector<1x256xf32> to vector<32x256xf32>
    %193 = arith.mulf %190, %192 : vector<32x256xf32>
    %c96_37 = arith.constant 96 : index
    %c0_38 = arith.constant 0 : index
    %194 = vector.load %arg10[%c96_37, %c0_38] : memref<288x256xf32, #tpu.memory_space<vmem>>, vector<32x256xf32>
    tpu.vector_store %arg10[%c96_37, %c0_38], %193 {strides = array<i32>} : memref<288x256xf32, #tpu.memory_space<vmem>>, vector<32x256xf32>,
    %195 = vector.extract_strided_slice %0 {offsets = [4, 0], sizes = [1, 256], strides = [1, 1]} : vector<9x256xf32> to vector<1x256xf32>
    %196 = vector.broadcast %195 : vector<1x256xf32> to vector<32x256xf32>
    %197 = arith.mulf %164, %196 : vector<32x256xf32>
    %c128_39 = arith.constant 128 : index
    %c0_40 = arith.constant 0 : index
    %198 = vector.load %arg10[%c128_39, %c0_40] : memref<288x256xf32, #tpu.memory_space<vmem>>, vector<32x256xf32>
    tpu.vector_store %arg10[%c128_39, %c0_40], %197 {strides = array<i32>} : memref<288x256xf32, #tpu.memory_space<vmem>>, vector<32x256xf32>,
    %199 = vector.extract_strided_slice %164 {offsets = [0, 1], sizes = [32, 255], strides = [1, 1]} : vector<32x256xf32> to vector<32x255xf32>
    %200 = vector.extract_strided_slice %164 {offsets = [0, 0], sizes = [32, 1], strides = [1, 1]} : vector<32x256xf32> to vector<32x1xf32>
    %201 = tpu.concatenate %199, %200 in 1 : vector<32x255xf32>, vector<32x1xf32> -> vector<32x256xf32>
    %202 = vector.extract_strided_slice %0 {offsets = [5, 0], sizes = [1, 256], strides = [1, 1]} : vector<9x256xf32> to vector<1x256xf32>
    %203 = vector.broadcast %202 : vector<1x256xf32> to vector<32x256xf32>
    %204 = arith.mulf %201, %203 : vector<32x256xf32>
    %c160 = arith.constant 160 : index
    %c0_41 = arith.constant 0 : index
    %205 = vector.load %arg10[%c160, %c0_41] : memref<288x256xf32, #tpu.memory_space<vmem>>, vector<32x256xf32>
    tpu.vector_store %arg10[%c160, %c0_41], %204 {strides = array<i32>} : memref<288x256xf32, #tpu.memory_space<vmem>>, vector<32x256xf32>,
    %206 = vector.extract_strided_slice %164 {offsets = [0, 15], sizes = [32, 241], strides = [1, 1]} : vector<32x256xf32> to vector<32x241xf32>
    %207 = vector.extract_strided_slice %164 {offsets = [0, 0], sizes = [32, 15], strides = [1, 1]} : vector<32x256xf32> to vector<32x15xf32>
    %208 = tpu.concatenate %206, %207 in 1 : vector<32x241xf32>, vector<32x15xf32> -> vector<32x256xf32>
    %209 = vector.extract_strided_slice %0 {offsets = [6, 0], sizes = [1, 256], strides = [1, 1]} : vector<9x256xf32> to vector<1x256xf32>
    %210 = vector.broadcast %209 : vector<1x256xf32> to vector<32x256xf32>
    %211 = arith.mulf %208, %210 : vector<32x256xf32>
    %c192 = arith.constant 192 : index
    %c0_42 = arith.constant 0 : index
    %212 = vector.load %arg10[%c192, %c0_42] : memref<288x256xf32, #tpu.memory_space<vmem>>, vector<32x256xf32>
    tpu.vector_store %arg10[%c192, %c0_42], %211 {strides = array<i32>} : memref<288x256xf32, #tpu.memory_space<vmem>>, vector<32x256xf32>,
    %213 = vector.extract_strided_slice %164 {offsets = [0, 16], sizes = [32, 240], strides = [1, 1]} : vector<32x256xf32> to vector<32x240xf32>
    %214 = vector.extract_strided_slice %164 {offsets = [0, 0], sizes = [32, 16], strides = [1, 1]} : vector<32x256xf32> to vector<32x16xf32>
    %215 = tpu.concatenate %213, %214 in 1 : vector<32x240xf32>, vector<32x16xf32> -> vector<32x256xf32>
    %216 = vector.extract_strided_slice %0 {offsets = [7, 0], sizes = [1, 256], strides = [1, 1]} : vector<9x256xf32> to vector<1x256xf32>
    %217 = vector.broadcast %216 : vector<1x256xf32> to vector<32x256xf32>
    %218 = arith.mulf %215, %217 : vector<32x256xf32>
    %c224 = arith.constant 224 : index
    %c0_43 = arith.constant 0 : index
    %219 = vector.load %arg10[%c224, %c0_43] : memref<288x256xf32, #tpu.memory_space<vmem>>, vector<32x256xf32>
    tpu.vector_store %arg10[%c224, %c0_43], %218 {strides = array<i32>} : memref<288x256xf32, #tpu.memory_space<vmem>>, vector<32x256xf32>,
    %220 = vector.extract_strided_slice %164 {offsets = [0, 17], sizes = [32, 239], strides = [1, 1]} : vector<32x256xf32> to vector<32x239xf32>
    %221 = vector.extract_strided_slice %164 {offsets = [0, 0], sizes = [32, 17], strides = [1, 1]} : vector<32x256xf32> to vector<32x17xf32>
    %222 = tpu.concatenate %220, %221 in 1 : vector<32x239xf32>, vector<32x17xf32> -> vector<32x256xf32>
    %223 = vector.extract_strided_slice %0 {offsets = [8, 0], sizes = [1, 256], strides = [1, 1]} : vector<9x256xf32> to vector<1x256xf32>
    %224 = vector.broadcast %223 : vector<1x256xf32> to vector<32x256xf32>
    %225 = arith.mulf %222, %224 : vector<32x256xf32>
    %c256 = arith.constant 256 : index
    %c0_44 = arith.constant 0 : index
    %226 = vector.load %arg10[%c256, %c0_44] : memref<288x256xf32, #tpu.memory_space<vmem>>, vector<32x256xf32>
    tpu.vector_store %arg10[%c256, %c0_44], %225 {strides = array<i32>} : memref<288x256xf32, #tpu.memory_space<vmem>>, vector<32x256xf32>,
    %c0_45 = arith.constant 0 : index
    %c0_46 = arith.constant 0 : index
    %227 = vector.load %arg10[%c0_45, %c0_46] : memref<288x256xf32, #tpu.memory_space<vmem>>, vector<288x256xf32>
    %cst_47 = arith.constant dense<0.000000e+00> : vector<4x256xf32>
    %228 = tpu.matmul %165, %227, %cst_47 {dimension_numbers = #tpu.dot_dimension_numbers<[1], [0], [0], [1], [0, 0, 1, 1], [], []>} : vector<4x288xf32>, vector<288x256xf32>, vector<4x256xf32> -> vector<4x256xf32>
    %229 = vector.broadcast %166 : vector<4x1xf32> to vector<4x256xf32>
    %230 = arith.addf %228, %229 : vector<4x256xf32>
    %c0_48 = arith.constant 0 : index
    %c0_49 = arith.constant 0 : index
    %c0_50 = arith.constant 0 : index
    %231 = vector.load %arg9[%c0_48, %c0_49, %c0_50] : memref<1x4x256xf32, #tpu.memory_space<vmem>>, vector<1x4x256xf32>
    %232 = vector.shape_cast %231 : vector<1x4x256xf32> to vector<4x256xf32>
    %233 = vector.shape_cast %230 : vector<4x256xf32> to vector<1x4x256xf32>
    tpu.vector_store %arg9[%c0_48, %c0_49, %c0_50], %233 {strides = array<i32>} : memref<1x4x256xf32, #tpu.memory_space<vmem>>, vector<1x4x256xf32>,
    return
  }
  func.func @transform_0(%arg0: i32) -> (i32, i32, i32) {
    %c0_i32 = arith.constant 0 : i32
    %c0_i32_0 = arith.constant 0 : i32
    %c0_i32_1 = arith.constant 0 : i32
    return %arg0, %c0_i32, %c0_i32_0 : i32, i32, i32
  }
  func.func @transform_1(%arg0: i32) -> (i32, i32) {
    %c0_i32 = arith.constant 0 : i32
    %c0_i32_0 = arith.constant 0 : i32
    %c0_i32_1 = arith.constant 0 : i32
    return %c0_i32, %c0_i32_0 : i32, i32
  }
  func.func @transform_2(%arg0: i32) -> (i32, i32) {
    %c0_i32 = arith.constant 0 : i32
    %c0_i32_0 = arith.constant 0 : i32
    %c0_i32_1 = arith.constant 0 : i32
    return %c0_i32, %c0_i32_0 : i32, i32
  }
  func.func @transform_3(%arg0: i32) -> (i32, i32) {
    %c0_i32 = arith.constant 0 : i32
    %c0_i32_0 = arith.constant 0 : i32
    %c0_i32_1 = arith.constant 0 : i32
    return %c0_i32, %c0_i32_0 : i32, i32
  }
  func.func @transform_4(%arg0: i32) -> (i32, i32) {
    %c0_i32 = arith.constant 0 : i32
    %c0_i32_0 = arith.constant 0 : i32
    %c0_i32_1 = arith.constant 0 : i32
    return %c0_i32, %c0_i32_0 : i32, i32
  }
  func.func @transform_5(%arg0: i32) -> (i32, i32) {
    %c0_i32 = arith.constant 0 : i32
    %c0_i32_0 = arith.constant 0 : i32
    %c0_i32_1 = arith.constant 0 : i32
    return %c0_i32, %c0_i32_0 : i32, i32
  }
  func.func @transform_6(%arg0: i32) -> (i32, i32) {
    %c0_i32 = arith.constant 0 : i32
    %c0_i32_0 = arith.constant 0 : i32
    %c0_i32_1 = arith.constant 0 : i32
    return %c0_i32, %c0_i32_0 : i32, i32
  }
  func.func @transform_7(%arg0: i32) -> (i32, i32) {
    %c0_i32 = arith.constant 0 : i32
    %c0_i32_0 = arith.constant 0 : i32
    %c0_i32_1 = arith.constant 0 : i32
    return %c0_i32, %c0_i32_0 : i32, i32
  }
  func.func @transform_8(%arg0: i32) -> (i32, i32, i32) {
    %c0_i32 = arith.constant 0 : i32
    %c0_i32_0 = arith.constant 0 : i32
    %c0_i32_1 = arith.constant 0 : i32
    return %arg0, %c0_i32, %c0_i32_0 : i32, i32, i32
  }
}

</mosaic_0001>

<bundles_post_ra>
// kernel: adv_sprelnet_forward.1
= control target key start
LH: loop header
LB: loop body
LE: loop exit
PB: predicated region body
PF: predicated region fallthrough
CT: control target
= control target key end

     0   :  { %s1921_s27 = smov 0   ;;  %s2720_s0 = inlined_call_operand.vmem [shape: f32[2,1,256], index: 0, kind: input, shape index: {}]   ;;  %s2721_s1 = inlined_call_operand.vmem [shape: f32[9,256], index: 1, kind: input, shape index: {}]   ;;  %s2722_s2 = inlined_call_operand.vmem [shape: f32[16,9], index: 2, kind: input, shape index: {}]   ;;  %s2723_s3 = inlined_call_operand.vmem [shape: f32[16,1], index: 3, kind: input, shape index: {}]   ;;  %s2724_s4 = inlined_call_operand.vmem [shape: f32[32,144], index: 4, kind: input, shape index: {}]   ;;  %s2725_s5 = inlined_call_operand.vmem [shape: f32[32,1], index: 5, kind: input, shape index: {}]   ;;  %s2726_s6 = inlined_call_operand.vmem [shape: f32[4,288], index: 6, kind: input, shape index: {}]   ;;  %s2727_s7 = inlined_call_operand.vmem [shape: f32[4,1], index: 7, kind: input, shape index: {}]   ;;  %s2728_s8 = inlined_call_operand.vmem [shape: f32[2,4,256], index: 8, kind: output, shape index: {}]  }
   0x1 LB: > { %s1785_s28 = sadd.s32 4294967295, %s1857_s27   ;;  %p1789_p0 = scmp.ge.s32.totalorder %s1857_s27, 1  ;;  %s1857_s27 = sphi %s1921_s27, %s18_s27  }
   0x2   : > { %p261_p1 = scmp.lt.s32.totalorder %s1857_s27, 3 }
   0x4   : > { %p262_p2 = pnand %p1789_p0, %p261_p1 }
   0x6   : > { %265 = sbr.rel (%p262_p2) target bundleno = 986 (0x3da), region = 52 }
   0xb   : > { %p294_p3 = scmp.lt.s32.totalorder %s1785_s28, 1  ;;  %v1859_v0 = vmov 0   ;;  %v1860_v1 = vmov 1   ;;  %s1861_s11 = smov 15   ;;  %v309_v5 = vld [vmem:[%s2722_s2 + $0x8] sm:$0xff]  ;;  %v308_v6 = vld [vmem:[%s2722_s2] sm:$0xff] }
   0xc   : > { %1831 = vset.pattern.permute.xlu2 %v1859_v0  ;;  %1832 = vset.pattern.permute.xlu0 %v1860_v1  ;;  %s1862_s12 = smov 16   ;;  %s1863_s13 = smov 17   ;;  %v1865_v7 = vmov 2   ;;  %v1867_v8 = vmov 3   ;;  %v1868_v9 = vmov 4   ;;  %v1872_v10 = vmov 6  }
   0xd   : > { %s2795_s28 = smov (!%p294_p3, %s1785_s28), 1  ;;  %1833 = vset.pattern.permute.xlu1 %v1859_v0  ;;  %s1864_s16 = smov 1   ;;  %v1873_v11 = vmov 5   ;;  %v1965_v12 = vld [vmem:[%s2721_s1] sm:$0xff]  ;;  %v1970_v13 = vld [vmem:[%s2721_s1 + $0x8] sm:$0xff]  ;;  %v1874_v14 = vmov 8  }
   0xe   : > { %s1790_s29 = sshll.u32 %s2795_s28, 1  ;;  %s1866_s19 = smov 127   ;;  %451 = vst [vmem:[#allocation1] sm:$0xff] %v1965_v12  ;;  %v1875_v15 = vmov 7   ;;  %vm388_vm0 = vcmask 121856   ;;  %v311_v17 = vld [vmem:[%s2723_s3 + $0x8] sm:$0xff] }
   0xf   : > { %s297_s10 = scalar_lea.vmem %s2720_s0, %s1790_s29  ;;  %s1869_s20 = smov 113   ;;  %452 = vst [vmem:[#allocation1 + $0x9] sm:$0xff] %v1970_v13  ;;  %v310_v18 = vld [vmem:[%s2723_s3] sm:$0xff]  ;;  %vm352_vm1 = vcmask 130048   ;;  %v360_v25 = vrot.slane %v1970_v13, 1  ;;  %vm320_vm2 = vcmask 138240  }
  0x10   : > { %v1937_v2 = vld [vmem:[%s297_s10] sm:$0x3]  ;;  %s1870_s21 = smov 111   ;;  %s1871_s22 = smov 112   ;;  %v1071_v35 = vld [vmem:[%s2726_s6 + $0x8] sm:$0xf] }
  0x11   : > { %v313_v3 = vperm.slane %v1937_v2, 1  ;;  %v317_v4 = vperm.slane %v1937_v2, 0  ;;  %v1070_v33 = vld [vmem:[%s2726_s6] sm:$0xff]  ;;  %v359_v38 = vrot.slane %v1965_v12, 1  ;;  %v393_v50 = vrot.slane %v1965_v12, 2 }
  0x12   : > { %v394_v51 = vrot.slane %v1970_v13, 2  ;;  %vm422_vm3 = vcmask 7168   ;;  %vm482_vm4 = vcmask 1039360   ;;  %vm516_vm5 = vcmask 924672  }
  0x13   : > { %383 = vrot.lane.b32.xlu2 %v313_v3, %s1861_s11  ;;  %347 = vrot.lane.b32.xlu1 %v313_v3, %s1862_s12  ;;  %vm550_vm6 = vcmask 916480   ;;  %vm584_vm7 = vcmask 908288   ;;  %vm1600_vm8 = vcmask 261120   ;;  %vm1726_vm9 = vcmask 1043456  }
  0x14   : > { %314 = vrot.lane.b32.xlu0 %v313_v3, %s1863_s13 }
  0x16   : > { %v454_v32 = vld [vmem:[#allocation1 + $0x4] ss:$9 sm:$0xff] }
  0x17   : > { %1592 = vst [vmem:[#allocation1] ss:$2 sm:$0xff] %v1070_v33 }
  0x18   : > { %1594 = vst [vmem:[#allocation1 + $0x10] ss:$2 sm:$0xff] %v1071_v35 }
  0x1b   : > { %386 = vrot.lane.b32.xlu2 %v317_v4, %s1861_s11  ;;  %350 = vrot.lane.b32.xlu1 %v317_v4, %s1862_s12 }
  0x1c   : > { %318 = vrot.lane.b32.xlu0 %v317_v4, %s1863_s13 }
  0x23   : > { %334 = vperm.xlu2 %1831, %v309_v5   ;;  %420 = vrot.lane.b32.xlu1 %v317_v4, %s1864_s16 }
  0x24   : > { %417 = vrot.lane.b32.xlu0 %v313_v3, %s1864_s16 }
  0x2b   : > { %1834 = vset.pattern.permute.xlu2 %v1860_v1  ;;  %329 = vperm.xlu1 %1833, %v308_v6  }
  0x2c   : > { %370 = vperm.xlu0 %1832, %v309_v5   ;;  %366 = vperm.xlu2 %1834, %v308_v6  }
  0x33   : > { %1835 = vset.pattern.permute.xlu1 %v1865_v7 }
  0x34   : > { %480 = vrot.lane.b32.xlu0 %v313_v3, %s1866_s19  ;;  %478 = vrot.lane.b32.xlu2 %v317_v4, %s1866_s19 }
  0x35   : > { %404 = vperm.xlu1 %1835, %v309_v5   ;;  %1836 = vset.pattern.permute.xlu2 %v1867_v8 }
  0x36   : > { %1837 = vset.pattern.permute.xlu0 %v1868_v9 }
  0x3c   : > { %512 = vrot.lane.b32.xlu0 %v317_v4, %s1869_s20  ;;  %438 = vperm.xlu2 %1836, %v309_v5  }
  0x3d   : > { %400 = vperm.xlu1 %1835, %v308_v6  }
  0x44   : > { %462 = vperm.xlu0 %1837, %v309_v5   ;;  %434 = vperm.xlu2 %1836, %v308_v6  }
  0x45   : > { %514 = vrot.lane.b32.xlu1 %v313_v3, %s1869_s20 }
  0x46   : > { %1838 = vset.pattern.permute.xlu1 %v1868_v9 }
  0x4c   : > { %580 = vrot.lane.b32.xlu0 %v317_v4, %s1870_s21  ;;  %548 = vrot.lane.b32.xlu2 %v313_v3, %s1871_s22 }
  0x4d   : > { %546 = vrot.lane.b32.xlu1 %v317_v4, %s1871_s22  ;;  %1840 = vset.pattern.permute.xlu0 %v1872_v10 }
  0x4e   : > { %1839 = vset.pattern.permute.xlu2 %v1873_v11 }
  0x54   : > { %533 = vperm.xlu0 %1840, %v309_v5   ;;  %499 = vperm.xlu2 %1839, %v309_v5  }
  0x55   : > { %458 = vperm.xlu1 %1838, %v308_v6  }
  0x5c   : > { %495 = vperm.xlu2 %1839, %v308_v6   ;;  %1845 = vset.pattern.permute.xlu0 %v1874_v14 }
  0x5d   : > { %582 = vrot.lane.b32.xlu1 %v313_v3, %s1870_s21  ;;  %593 = vperm.xlu0 %1845, %v308_v6  }
  0x5e   : > { %1841 = vset.pattern.permute.xlu1 %v1872_v10 }
  0x64   : > { %1842 = vset.pattern.permute.xlu2 %v1875_v15 }
  0x65   : > { %529 = vperm.xlu1 %1841, %v308_v6   ;;  %567 = vperm.xlu2 %1842, %v309_v5  }
  0x66   : > { %1848 = vset.pattern.permute.xlu0 %v1859_v0 }
  0x6d   : > { %1843 = vset.pattern.permute.xlu1 %v1875_v15  ;;  %v384_v16 = vpop.permute.xlu2 %383  ;;  %1844 = vset.pattern.permute.xlu2 %v1874_v14 }
  0x6e   : > { %563 = vperm.xlu1 %1843, %v308_v6   ;;  %597 = vperm.xlu2 %1844, %v309_v5   ;;  %v427_v5 = vrot.slane %v1965_v12, 3  ;;  %v428_v6 = vrot.slane %v1970_v13, 3 }
  0x75   : > { %v387_v19 = vpop.permute.xlu2 %386 }
  0x76   : > { %1846 = vset.pattern.permute.xlu1 %v1859_v0  ;;  %v389_v20 = vsel %vm388_vm0, %v387_v19, %v384_v16  ;;  %v392_v21 = vsel %vm388_vm0, %v384_v16, %v387_v19  ;;  %1847 = vset.pattern.permute.xlu2 %v1859_v0 }
  0x77   : > { %617 = vperm.xlu1 %1846, %v311_v17   ;;  %612 = vperm.xlu2 %1847, %v310_v18   ;;  %v397_v59 = vmul.f32 %v393_v50, %v392_v21  ;;  %v398_v60 = vmul.f32 %v394_v51, %v389_v20  ;;  %v456_v21 = vmul.f32 %v454_v32, %v1937_v2 }
  0x79   : > { %v407_v62 = vperm.slane %v397_v59, 0  ;;  %v408_v63 = vperm.slane %v398_v60, 0  ;;  %v467_v33 = vperm.slane %v456_v21, 1 }
  0x7d   : > { %v335_v23 = vpop.permute.xlu2 %334 }
  0x85   : > { %v348_v22 = vpop.permute.xlu1 %347 }
  0x86   : > { %v315_v24 = vpop.permute.xlu0 %314  ;;  %v367_v30 = vpop.permute.xlu2 %366 }
  0x8d   : > { %v351_v26 = vpop.permute.xlu1 %350 }
  0x8e   : > { %v353_v27 = vsel %vm352_vm1, %v351_v26, %v348_v22  ;;  %v319_v28 = vpop.permute.xlu0 %318  ;;  %v356_v40 = vsel %vm352_vm1, %v348_v22, %v351_v26  ;;  %v2000_v45 = vpop.permute.xlu2 %478 }
  0x8f   : > { %v364_v29 = vmul.f32 %v360_v25, %v353_v27  ;;  %v321_v36 = vsel %vm320_vm2, %v319_v28, %v315_v24  ;;  %v324_v37 = vsel %vm320_vm2, %v315_v24, %v319_v28  ;;  %v363_v44 = vmul.f32 %v359_v38, %v356_v40 }
  0x90   : > { %v325_v42 = vmul.f32 %v324_v37, %v1965_v12  ;;  %v326_v43 = vmul.f32 %v321_v36, %v1970_v13 }
  0x91   : > { %v374_v31 = vperm.slane %v364_v29, 0  ;;  %v373_v48 = vperm.slane %v363_v44, 0 }
  0x92   : > { %v337_v46 = vperm.slane %v325_v42, 0  ;;  %v338_v47 = vperm.slane %v326_v43, 0 }
  0x93   : > { %v376_v34 = vmul.f32 %v374_v31, %v367_v30  ;;  %v375_v17 = vmul.f32 %v373_v48, %v367_v30 }
  0x94   : > { %v341_v53 = vmul.f32 %v337_v46, %v335_v23  ;;  %v342_v54 = vmul.f32 %v338_v47, %v335_v23 }
  0x95   : > { %v421_v39 = vpop.permute.xlu1 %420 }
  0x96   : > { %v418_v41 = vpop.permute.xlu0 %417  ;;  %v439_v61 = vpop.permute.xlu2 %438 }
  0x97   : > { %v423_v7 = vsel %vm422_vm3, %v421_v39, %v418_v41  ;;  %v426_v8 = vsel %vm422_vm3, %v418_v41, %v421_v39 }
  0x98   : > { %v431_v15 = vmul.f32 %v427_v5, %v426_v8  ;;  %v432_v16 = vmul.f32 %v428_v6, %v423_v7  ;;  %v556_v7 = vrot.slane %v1965_v12, 7  ;;  %v557_v8 = vrot.slane %v1970_v13, 7 }
  0x9a   : > { %v441_v26 = vperm.slane %v431_v15, 0  ;;  %v442_v27 = vperm.slane %v432_v16, 0  ;;  %v306_v16 = vld [vmem:[%s2721_s1 + $0x18] sm:$0x1] }
  0x9c   : > { %v445_v35 = vmul.f32 %v441_v26, %v439_v61  ;;  %v446_v36 = vmul.f32 %v442_v27, %v439_v61  ;;  %v522_v61 = vrot.slane %v1965_v12, 6 }
  0x9d   : > { %v330_v49 = vpop.permute.xlu1 %329 }
  0x9e   : > { %v371_v52 = vpop.permute.xlu0 %370  ;;  %v339_v11 = vmul.f32 %v337_v46, %v330_v49  ;;  %v340_v14 = vmul.f32 %v338_v47, %v330_v49  ;;  %v435_v18 = vpop.permute.xlu2 %434 }
  0x9f   : > { %v377_v55 = vmul.f32 %v373_v48, %v371_v52  ;;  %v378_v56 = vmul.f32 %v374_v31, %v371_v52  ;;  %v466_v31 = vperm.slane %v456_v21, 0  ;;  %v443_v44 = vmul.f32 %v441_v26, %v435_v18 }
  0xa0   : > { %v379_v22 = vadd.f32 %v375_v17, %v339_v11  ;;  %v380_v23 = vadd.f32 %v376_v34, %v340_v14  ;;  %v444_v46 = vmul.f32 %v442_v27, %v435_v18  ;;  %v305_v14 = vld [vmem:[%s2721_s1 + $0x10] sm:$0x1] }
  0xa1   : > { %v381_v57 = vadd.f32 %v377_v55, %v341_v53  ;;  %v382_v58 = vadd.f32 %v378_v56, %v342_v54 }
  0xa6   : > { %v481_v0 = vpop.permute.xlu0 %480  ;;  %v549_v42 = vpop.permute.xlu2 %548 }
  0xa7   : > { %v405_v1 = vpop.permute.xlu1 %404  ;;  %v483_v59 = vsel %vm482_vm4, %v2000_v45, %v481_v0  ;;  %v487_v60 = vsel %vm482_vm4, %v481_v0, %v2000_v45 }
  0xa8   : > { %v411_v3 = vmul.f32 %v407_v62, %v405_v1  ;;  %v412_v4 = vmul.f32 %v408_v63, %v405_v1 }
  0xaa   : > { %v415_v9 = vadd.f32 %v411_v3, %v381_v57  ;;  %v416_v10 = vadd.f32 %v412_v4, %v382_v58  ;;  %v488_v57 = vrot.slane %v1965_v12, 5  ;;  %v489_v58 = vrot.slane %v1970_v13, 5 }
  0xac   : > { %v449_v38 = vadd.f32 %v445_v35, %v415_v9  ;;  %v450_v30 = vadd.f32 %v446_v36, %v416_v10  ;;  %v492_v4 = vmul.f32 %v488_v57, %v483_v59  ;;  %v493_v5 = vmul.f32 %v489_v58, %v487_v60 }
  0xae   : > { %v513_v19 = vpop.permute.xlu0 %512  ;;  %v500_v43 = vpop.permute.xlu2 %499  ;;  %v502_v18 = vperm.slane %v492_v4, 0 }
  0xaf   : > { %v401_v20 = vpop.permute.xlu1 %400 }
  0xb0   : > { %v409_v24 = vmul.f32 %v407_v62, %v401_v20  ;;  %v410_v25 = vmul.f32 %v408_v63, %v401_v20  ;;  %v523_v62 = vrot.slane %v1970_v13, 6 }
  0xb2   : > { %v413_v28 = vadd.f32 %v409_v24, %v379_v22  ;;  %v414_v29 = vadd.f32 %v410_v25, %v380_v23 }
  0xb4   : > { %v447_v48 = vadd.f32 %v443_v44, %v413_v28  ;;  %v448_v49 = vadd.f32 %v444_v46, %v414_v29  ;;  %v506_v29 = vmul.f32 %v502_v18, %v500_v43 }
  0xb6   : > { %v463_v37 = vpop.permute.xlu0 %462  ;;  %v496_v54 = vpop.permute.xlu2 %495 }
  0xb7   : > { %v472_v39 = vmul.f32 %v466_v31, %v463_v37  ;;  %v473_v40 = vmul.f32 %v467_v33, %v463_v37  ;;  %v515_v41 = vpop.permute.xlu1 %514  ;;  %v504_v27 = vmul.f32 %v502_v18, %v496_v54 }
  0xb8   : > { %v517_v63 = vsel %vm516_vm5, %v513_v19, %v515_v41  ;;  %v521_v3 = vsel %vm516_vm5, %v515_v41, %v513_v19  ;;  %v503_v19 = vperm.slane %v493_v5, 0 }
  0xb9   : > { %v476_v2 = vadd.f32 %v472_v39, %v449_v38  ;;  %v477_v32 = vadd.f32 %v473_v40, %v450_v30  ;;  %v526_v6 = vmul.f32 %v522_v61, %v517_v63  ;;  %v527_v45 = vmul.f32 %v523_v62, %v521_v3 }
  0xbb   : > { %v536_v20 = vperm.slane %v526_v6, 0  ;;  %v537_v24 = vperm.slane %v527_v45, 0  ;;  %v510_v39 = vadd.f32 %v506_v29, %v476_v2  ;;  %v2126_v29 = vperm.slane %v1965_v12, 6 }
  0xbe   : > { %v581_v55 = vpop.permute.xlu0 %580 }
  0xbf   : > { %v547_v34 = vpop.permute.xlu1 %546  ;;  %v568_v1 = vpop.permute.xlu2 %567 }
  0xc0   : > { %v551_v0 = vsel %vm550_vm6, %v547_v34, %v549_v42  ;;  %v555_v10 = vsel %vm550_vm6, %v549_v42, %v547_v34 }
  0xc1   : > { %v560_v21 = vmul.f32 %v556_v7, %v551_v0  ;;  %v561_v22 = vmul.f32 %v557_v8, %v555_v10 }
  0xc3   : > { %v570_v36 = vperm.slane %v560_v21, 0  ;;  %v571_v37 = vperm.slane %v561_v22, 0 }
  0xc6   : > { %v534_v11 = vpop.permute.xlu0 %533 }
  0xc7   : > { %v459_v47 = vpop.permute.xlu1 %458  ;;  %v541_v35 = vmul.f32 %v537_v24, %v534_v11 }
  0xc8   : > { %v470_v50 = vmul.f32 %v466_v31, %v459_v47  ;;  %v471_v51 = vmul.f32 %v467_v33, %v459_v47  ;;  %v598_v26 = vpop.permute.xlu2 %597  ;;  %v507_v31 = vmul.f32 %v503_v19, %v500_v43  ;;  %v540_v33 = vmul.f32 %v536_v20, %v534_v11  ;;  %v637_v11 = vld [vmem:[%s2725_s5 + $0x8] sm:$0xff] }
  0xc9   : > { %v505_v47 = vmul.f32 %v503_v19, %v496_v54  ;;  %v2116_v19 = vperm.slane %v1965_v12, 7 }
  0xca   : > { %v474_v52 = vadd.f32 %v470_v50, %v447_v48  ;;  %v2009_v53 = vadd.f32 %v471_v51, %v448_v49  ;;  %v511_v40 = vadd.f32 %v507_v31, %v477_v32  ;;  %v544_v48 = vadd.f32 %v540_v33, %v510_v39 }
  0xcb   : > { %v574_v51 = vmul.f32 %v570_v36, %v568_v1  ;;  %v2129_v31 = vperm.slane %v1970_v13, 6 }
  0xcc   : > { %v508_v30 = vadd.f32 %v504_v27, %v474_v52  ;;  %v545_v49 = vadd.f32 %v541_v35, %v511_v40  ;;  %v509_v59 = vadd.f32 %v505_v47, %v2009_v53 }
  0xcd   : > { %v578_v61 = vadd.f32 %v574_v51, %v544_v48 }
  0xcf   : > { %v583_v56 = vpop.permute.xlu1 %582  ;;  %v594_v42 = vpop.permute.xlu0 %593 }
  0xd0   : > { %v585_v15 = vsel %vm584_vm7, %v581_v55, %v583_v56  ;;  %v589_v17 = vsel %vm584_vm7, %v583_v56, %v581_v55  ;;  %v575_v55 = vmul.f32 %v571_v37, %v568_v1 }
  0xd1   : > { %v590_v23 = vmul.f32 %v585_v15, %v305_v14  ;;  %v591_v25 = vmul.f32 %v589_v17, %v306_v16  ;;  %v613_v2 = vpop.permute.xlu2 %612  ;;  %v638_v14 = vld [vmem:[%s2725_s5 + $0x10] sm:$0xff]  ;;  %v636_v16 = vld [vmem:[%s2725_s5] sm:$0xff] }
  0xd2   : > { %v579_v62 = vadd.f32 %v575_v55, %v545_v49  ;;  %v2144_v55 = vperm.slane %v1965_v12, 5 }
  0xd3   : > { %v600_v38 = vperm.slane %v590_v23, 0  ;;  %v601_v41 = vperm.slane %v591_v25, 0 }
  0xd5   : > { %v602_v43 = vmul.f32 %v600_v38, %v594_v42  ;;  %v604_v57 = vmul.f32 %v600_v38, %v598_v26  ;;  %v605_v58 = vmul.f32 %v601_v41, %v598_v26  ;;  %v603_v1 = vmul.f32 %v601_v41, %v594_v42 }
  0xd7   : > { %v530_v9 = vpop.permute.xlu1 %529  ;;  %v608_v54 = vadd.f32 %v604_v57, %v578_v61  ;;  %v609_v4 = vadd.f32 %v605_v58, %v579_v62  ;;  %v2158_v61 = vperm.slane %v1965_v12, 4  ;;  %v2161_v62 = vperm.slane %v1970_v13, 4 }
  0xd8   : > { %v538_v28 = vmul.f32 %v536_v20, %v530_v9  ;;  %v539_v50 = vmul.f32 %v537_v24, %v530_v9  ;;  %v2119_v20 = vperm.slane %v1970_v13, 7 }
  0xd9   : > { %2750 = vst [vmem:[#allocation3_spill] sm:$0xff] %v2161_v62 }
  0xda   : > { %v542_v44 = vadd.f32 %v538_v28, %v508_v30  ;;  %v543_v60 = vadd.f32 %v539_v50, %v509_v59 }
  0xe0   : > { %v564_v34 = vpop.permute.xlu1 %563 }
  0xe1   : > { %v572_v46 = vmul.f32 %v570_v36, %v564_v34  ;;  %v573_v52 = vmul.f32 %v571_v37, %v564_v34 }
  0xe3   : > { %v576_v56 = vadd.f32 %v572_v46, %v542_v44  ;;  %v577_v3 = vadd.f32 %v573_v52, %v543_v60 }
  0xe5   : > { %v606_v32 = vadd.f32 %v602_v43, %v576_v56  ;;  %v607_v53 = vadd.f32 %v603_v1, %v577_v3  ;;  %v2147_v43 = vperm.slane %v1970_v13, 5  ;;  %v2171_v1 = vperm.slane %v1970_v13, 3 }
  0xe7   : > { %v620_v63 = vadd.f32 %v613_v2, %v606_v32  ;;  %v621_v0 = vadd.f32 %v613_v2, %v607_v53 }
  0xe9   : > { %v2034_v5 = vmax.f32 %v620_v63, 0.0  ;;  %v618_v6 = vpop.permute.xlu1 %617  ;;  %v2048_v10 = vmax.f32 %v621_v0, 0.0 }
  0xea   : > { %v622_v7 = vadd.f32 %v618_v6, %v608_v54  ;;  %v623_v8 = vadd.f32 %v618_v6, %v609_v4  ;;  %v2168_v6 = vperm.slane %v1965_v12, 3 }
  0xeb   : > { %822 = vrot.lane.b32.xlu0 %v2034_v5, %s1871_s22  ;;  %v759_v53 = vmul.f32 %v2161_v62, %v2048_v10 }
  0xec   : > { %v2038_v9 = vmax.f32 %v622_v7, 0.0  ;;  %v2040_v45 = vmax.f32 %v623_v8, 0.0  ;;  %v758_v8 = vmul.f32 %v2158_v61, %v2034_v5 }
  0xee   : > { %828 = vrot.lane.b32.xlu2 %v2040_v45, %s1871_s22  ;;  %826 = vrot.lane.b32.xlu1 %v2038_v9, %s1871_s22  ;;  %v760_v54 = vmul.f32 %v2158_v61, %v2038_v9  ;;  %v761_v4 = vmul.f32 %v2161_v62, %v2040_v45 }
  0xf3   : > { %800 = vrot.lane.b32.xlu0 %v2040_v45, %s1869_s20 }
  0xf6   : > { %798 = vrot.lane.b32.xlu2 %v2038_v9, %s1869_s20  ;;  %824 = vrot.lane.b32.xlu1 %v2048_v10, %s1871_s22 }
  0xfb   : > { %770 = vrot.lane.b32.xlu0 %v2038_v9, %s1866_s19 }
  0xfe   : > { %796 = vrot.lane.b32.xlu2 %v2048_v10, %s1869_s20  ;;  %794 = vrot.lane.b32.xlu1 %v2034_v5, %s1869_s20 }
 0x103   : > { %768 = vrot.lane.b32.xlu0 %v2048_v10, %s1866_s19 }
 0x106   : > { %766 = vrot.lane.b32.xlu2 %v2034_v5, %s1866_s19  ;;  %772 = vrot.lane.b32.xlu1 %v2040_v45, %s1866_s19 }
 0x10b   : > { %728 = vrot.lane.b32.xlu0 %v2048_v10, %s1864_s16 }
 0x10e   : > { %736 = vrot.lane.b32.xlu2 %v2038_v9, %s1864_s16  ;;  %730 = vrot.lane.b32.xlu1 %v2040_v45, %s1864_s16 }
 0x113   : > { %708 = vrot.lane.b32.xlu0 %v2038_v9, %s1861_s11 }
 0x116   : > { %702 = vrot.lane.b32.xlu2 %v2040_v45, %s1861_s11  ;;  %734 = vrot.lane.b32.xlu1 %v2034_v5, %s1864_s16 }
 0x11b   : > { %674 = vrot.lane.b32.xlu0 %v2040_v45, %s1862_s12 }
 0x11e   : > { %706 = vrot.lane.b32.xlu2 %v2034_v5, %s1861_s11  ;;  %700 = vrot.lane.b32.xlu1 %v2048_v10, %s1861_s11 }
 0x123   : > { %678 = vrot.lane.b32.xlu0 %v2034_v5, %s1862_s12 }
 0x126   : > { %672 = vrot.lane.b32.xlu2 %v2048_v10, %s1862_s12  ;;  %680 = vrot.lane.b32.xlu1 %v2038_v9, %s1862_s12 }
 0x12b   : > { %642 = vrot.lane.b32.xlu0 %v2048_v10, %s1863_s13 }
 0x12e   : > { %652 = vrot.lane.b32.xlu2 %v2038_v9, %s1863_s13  ;;  %644 = vrot.lane.b32.xlu1 %v2040_v45, %s1863_s13 }
 0x133   : > { %856 = vrot.lane.b32.xlu0 %v2040_v45, %s1870_s21 }
 0x136   : > { %854 = vrot.lane.b32.xlu2 %v2038_v9, %s1870_s21  ;;  %650 = vrot.lane.b32.xlu1 %v2034_v5, %s1863_s13 }
 0x13e   : > { %852 = vrot.lane.b32.xlu2 %v2048_v10, %s1870_s21  ;;  %850 = vrot.lane.b32.xlu1 %v2034_v5, %s1870_s21  ;;  %v2182_v5 = vperm.slane %v1965_v12, 2  ;;  %v2185_v10 = vperm.slane %v1970_v13, 2 }
 0x146   : > { %921 = vperm.xlu2 %1847, %v637_v11   ;;  %926 = vperm.xlu1 %1846, %v638_v14  }
 0x148   : > { %v829_v15 = vpop.permute.xlu2 %828 }
 0x14e   : > { %916 = vperm.xlu1 %1846, %v636_v16  }
 0x150   : > { %v799_v17 = vpop.permute.xlu2 %798 }
 0x158   : > { %v797_v21 = vpop.permute.xlu2 %796 }
 0x15d   : > { %v823_v18 = vpop.permute.xlu0 %822 }
 0x160   : > { %v827_v22 = vpop.permute.xlu1 %826  ;;  %v767_v33 = vpop.permute.xlu2 %766 }
 0x161   : > { %v831_v23 = vsel %vm550_vm6, %v827_v22, %v829_v15  ;;  %v839_v24 = vsel %vm550_vm6, %v829_v15, %v827_v22 }
 0x162   : > { %v844_v25 = vmul.f32 %v2116_v19, %v831_v23  ;;  %v845_v26 = vmul.f32 %v2119_v20, %v839_v24 }
 0x164   : > { %946 = vmatpush.msra.mxu0 %v844_v25  ;;  %1004 = vmatpush.msra.mxu2 %v845_v26 }
 0x165   : > { %v801_v27 = vpop.permute.xlu0 %800 }
 0x166   : > { %v803_v35 = vsel %vm516_vm5, %v799_v17, %v801_v27  ;;  %v811_v36 = vsel %vm516_vm5, %v801_v27, %v799_v17 }
 0x167   : > { %v816_v40 = vmul.f32 %v2126_v29, %v803_v35  ;;  %v817_v41 = vmul.f32 %v2129_v31, %v811_v36 }
 0x168   : > { %v825_v28 = vpop.permute.xlu1 %824  ;;  %v737_v49 = vpop.permute.xlu2 %736 }
 0x169   : > { %v830_v37 = vsel %vm550_vm6, %v823_v18, %v825_v28  ;;  %v838_v38 = vsel %vm550_vm6, %v825_v28, %v823_v18 }
 0x16a   : > { %v842_v30 = vmul.f32 %v2116_v19, %v830_v37  ;;  %v843_v39 = vmul.f32 %v2119_v20, %v838_v38 }
 0x16c   : > { %947 = vmatpush.msra.mxu0 %v842_v30  ;;  %1005 = vmatpush.msra.mxu2 %v843_v39 }
 0x16d   : > { %v771_v42 = vpop.permute.xlu0 %770 }
 0x16e   : > { %948 = vmatpush.msra.mxu0 %v816_v40  ;;  %1006 = vmatpush.msra.mxu2 %v817_v41  ;;  %v2200_v40 = vperm.slane %v1965_v12, 1  ;;  %v2203_v41 = vperm.slane %v1970_v13, 1 }
 0x170   : > { %v795_v34 = vpop.permute.xlu1 %794  ;;  %v703_v63 = vpop.permute.xlu2 %702 }
 0x171   : > { %v802_v44 = vsel %vm516_vm5, %v795_v34, %v797_v21  ;;  %v810_v46 = vsel %vm516_vm5, %v797_v21, %v795_v34 }
 0x172   : > { %v814_v47 = vmul.f32 %v2126_v29, %v802_v44  ;;  %v815_v48 = vmul.f32 %v2129_v31, %v810_v46 }
 0x174   : > { %949 = vmatpush.msra.mxu0 %v814_v47  ;;  %1007 = vmatpush.msra.mxu2 %v815_v48 }
 0x175   : > { %v769_v50 = vpop.permute.xlu0 %768 }
 0x176   : > { %v774_v56 = vsel %vm482_vm4, %v767_v33, %v769_v50  ;;  %v782_v57 = vsel %vm482_vm4, %v769_v50, %v767_v33 }
 0x177   : > { %v786_v32 = vmul.f32 %v2144_v55, %v774_v56  ;;  %v787_v60 = vmul.f32 %v2147_v43, %v782_v57  ;;  %v2214_v57 = vperm.slane %v1965_v12, 0  ;;  %v2231_v12 = vld [vmem:[%s2721_s1 + $0x18] ss:$0 sm:$0xff] }
 0x178   : > { %v773_v51 = vpop.permute.xlu1 %772  ;;  %v707_v15 = vpop.permute.xlu2 %706  ;;  %2754 = vst [vmem:[#allocation7_spill] sm:$0xff] %v2231_v12 }
 0x179   : > { %v775_v58 = vsel %vm482_vm4, %v771_v42, %v773_v51  ;;  %v783_v59 = vsel %vm482_vm4, %v773_v51, %v771_v42  ;;  %2751 = vst [vmem:[#allocation4_spill] sm:$0xff] %v2214_v57 }
 0x17a   : > { %v788_v52 = vmul.f32 %v2144_v55, %v775_v58  ;;  %v789_v2 = vmul.f32 %v2147_v43, %v783_v59  ;;  %v2217_v58 = vperm.slane %v1970_v13, 0 }
 0x17c   : > { %950 = vmatpush.msra.mxu0 %v788_v52  ;;  %1008 = vmatpush.msra.mxu2 %v789_v2  ;;  %2752 = vst [vmem:[#allocation5_spill] sm:$0xff] %v2217_v58 }
 0x17d   : > { %v729_v3 = vpop.permute.xlu0 %728 }
 0x17e   : > { %951 = vmatpush.msra.mxu0 %v786_v32  ;;  %1009 = vmatpush.msra.mxu2 %v787_v60 }
 0x180   : > { %v731_v7 = vpop.permute.xlu1 %730  ;;  %952 = vmatpush.msra.mxu0 %v760_v54  ;;  %1010 = vmatpush.msra.mxu2 %v761_v4  ;;  %v673_v33 = vpop.permute.xlu2 %672 }
 0x181   : > { %v739_v9 = vsel %vm422_vm3, %v737_v49, %v731_v7  ;;  %v745_v0 = vsel %vm422_vm3, %v731_v7, %v737_v49 }
 0x182   : > { %953 = vmatpush.msra.mxu0 %v758_v8  ;;  %1011 = vmatpush.msra.mxu2 %v759_v53  ;;  %v750_v45 = vmul.f32 %v2168_v6, %v745_v0  ;;  %v751_v11 = vmul.f32 %v2171_v1, %v739_v9 }
 0x184   : > { %954 = vmatpush.msra.mxu0 %v750_v45  ;;  %1012 = vmatpush.msra.mxu2 %v751_v11 }
 0x185   : > { %v709_v14 = vpop.permute.xlu0 %708 }
 0x186   : > { %v711_v17 = vsel %vm388_vm0, %v709_v14, %v703_v63  ;;  %v717_v18 = vsel %vm388_vm0, %v703_v63, %v709_v14  ;;  %v2226_v63 = vld [vmem:[%s2721_s1 + $0x10] ss:$0 sm:$0xff]  ;;  %v628_v14 = vld [vmem:[%s2724_s4] sm:$0xff] }
 0x187   : > { %v722_v25 = vmul.f32 %v2182_v5, %v717_v18  ;;  %v723_v26 = vmul.f32 %v2185_v10, %v711_v17  ;;  %2753 = vst [vmem:[#allocation6_spill] sm:$0xff] %v2226_v63 }
 0x188   : > { %v735_v16 = vpop.permute.xlu1 %734  ;;  %v653_v49 = vpop.permute.xlu2 %652 }
 0x189   : > { %v738_v21 = vsel %vm422_vm3, %v735_v16, %v729_v3  ;;  %v744_v22 = vsel %vm422_vm3, %v729_v3, %v735_v16 }
 0x18a   : > { %v748_v23 = vmul.f32 %v2168_v6, %v744_v22  ;;  %v749_v24 = vmul.f32 %v2171_v1, %v738_v21 }
 0x18c   : > { %955 = vmatpush.msra.mxu0 %v748_v23  ;;  %1013 = vmatpush.msra.mxu2 %v749_v24  ;;  %v630_v24 = vld [vmem:[%s2724_s4 + $0x10] sm:$0xff] }
 0x18d   : > { %v675_v27 = vpop.permute.xlu0 %674 }
 0x18e   : > { %956 = vmatpush.msra.mxu0 %v722_v25  ;;  %1014 = vmatpush.msra.mxu2 %v723_v26  ;;  %v629_v25 = vld [vmem:[%s2724_s4 + $0x8] sm:$0xff]  ;;  %v632_v26 = vld [vmem:[%s2724_s4 + $0x20] sm:$0xff] }
 0x190   : > { %v701_v28 = vpop.permute.xlu1 %700  ;;  %v855_v13 = vpop.permute.xlu2 %854 }
 0x191   : > { %v710_v35 = vsel %vm388_vm0, %v707_v15, %v701_v28  ;;  %v716_v36 = vsel %vm388_vm0, %v701_v28, %v707_v15  ;;  %v639_v15 = vld [vmem:[%s2725_s5 + $0x18] sm:$0xff]  ;;  %v633_v28 = vld [vmem:[%s2724_s4 + $0x28] sm:$0xff] }
 0x192   : > { %v720_v37 = vmul.f32 %v2182_v5, %v716_v36  ;;  %v721_v38 = vmul.f32 %v2185_v10, %v710_v35  ;;  %931 = vperm.xlu0 %1848, %v639_v15   ;;  %v635_v35 = vld [vmem:[%s2724_s4 + $0x38] sm:$0xff] }
 0x194   : > { %957 = vmatpush.msra.mxu0 %v720_v37  ;;  %1015 = vmatpush.msra.mxu2 %v721_v38 }
 0x195   : > { %v679_v30 = vpop.permute.xlu0 %678 }
 0x196   : > { %v682_v42 = vsel %vm352_vm1, %v679_v30, %v673_v33  ;;  %v688_v34 = vsel %vm352_vm1, %v673_v33, %v679_v30  ;;  %v634_v33 = vld [vmem:[%s2724_s4 + $0x30] sm:$0xff] }
 0x197   : > { %v692_v50 = vmul.f32 %v2200_v40, %v688_v34  ;;  %v693_v51 = vmul.f32 %v2203_v41, %v682_v42 }
 0x198   : > { %v681_v39 = vpop.permute.xlu1 %680  ;;  %v853_v16 = vpop.permute.xlu2 %852 }
 0x199   : > { %v683_v44 = vsel %vm352_vm1, %v681_v39, %v675_v27  ;;  %v689_v46 = vsel %vm352_vm1, %v675_v27, %v681_v39  ;;  %v631_v27 = vld [vmem:[%s2724_s4 + $0x18] sm:$0xff] }
 0x19a   : > { %v694_v47 = vmul.f32 %v2200_v40, %v689_v46  ;;  %v695_v48 = vmul.f32 %v2203_v41, %v683_v44 }
 0x19c   : > { %958 = vmatpush.msra.mxu0 %v694_v47  ;;  %1016 = vmatpush.msra.mxu2 %v695_v48 }
 0x19d   : > { %v643_v56 = vpop.permute.xlu0 %642 }
 0x19e   : > { %959 = vmatpush.msra.mxu0 %v692_v50  ;;  %1017 = vmatpush.msra.mxu2 %v693_v51 }
 0x1a0   : > { %v645_v59 = vpop.permute.xlu1 %644  ;;  %v922_v51 = vpop.permute.xlu2 %921 }
 0x1a1   : > { %v655_v52 = vsel %vm320_vm2, %v653_v49, %v645_v59  ;;  %v661_v2 = vsel %vm320_vm2, %v645_v59, %v653_v49 }
 0x1a2   : > { %v666_v32 = vmul.f32 %v2214_v57, %v661_v2  ;;  %v667_v60 = vmul.f32 %v2217_v58, %v655_v52 }
 0x1a4   : > { %960 = vmatpush.msra.mxu0 %v666_v32  ;;  %1018 = vmatpush.msra.mxu2 %v667_v60 }
 0x1a5   : > { %v857_v3 = vpop.permute.xlu0 %856 }
 0x1a6   : > { %v859_v54 = vsel %vm584_vm7, %v855_v13, %v857_v3  ;;  %v867_v4 = vsel %vm584_vm7, %v857_v3, %v855_v13 }
 0x1a7   : > { %v872_v7 = vmul.f32 %v2226_v63, %v859_v54  ;;  %v873_v8 = vmul.f32 %v2231_v12, %v867_v4 }
 0x1a8   : > { %v651_v53 = vpop.permute.xlu1 %650 }
 0x1a9   : > { %v654_v9 = vsel %vm320_vm2, %v651_v53, %v643_v56  ;;  %v660_v0 = vsel %vm320_vm2, %v643_v56, %v651_v53  ;;  %989 = vmatpush.msra.mxu1 %v872_v7  ;;  %1047 = vmatpush.msra.mxu3 %v873_v8 }
 0x1aa   : > { %v664_v45 = vmul.f32 %v2214_v57, %v660_v0  ;;  %v665_v11 = vmul.f32 %v2217_v58, %v654_v9 }
 0x1ac   : > { %961 = vmatpush.msra.mxu0 %v664_v45  ;;  %1019 = vmatpush.msra.mxu2 %v665_v11 }
 0x1ad   : > { %962 = vmatmul.f32.vlgmr.msra.gmra.mxu0 %v628_v14  ;;  %1020 = vmatmul.f32.vlgmr.msra.gmra.mxu2 %v628_v14 }
 0x1b0   : > { %v851_v17 = vpop.permute.xlu1 %850 }
 0x1b1   : > { %v858_v18 = vsel %vm584_vm7, %v851_v17, %v853_v16  ;;  %v866_v21 = vsel %vm584_vm7, %v853_v16, %v851_v17 }
 0x1b2   : > { %v870_v22 = vmul.f32 %v2226_v63, %v858_v18  ;;  %v871_v23 = vmul.f32 %v2231_v12, %v866_v21 }
 0x1b4   : > { %990 = vmatpush.msra.mxu1 %v870_v22  ;;  %1048 = vmatpush.msra.mxu3 %v871_v23 }
 0x1b5   : > { %965 = vmatmul.f32.gmra.mxu0 %v630_v24  ;;  %1793 = vmatmul.msk.f32.vlgmr.msra.gmra.mxu1 %vm352_vm1, %v629_v25 }
 0x1b6   : > { %1023 = vmatmul.f32.gmra.mxu2 %v630_v24  ;;  %1797 = vmatmul.msk.f32.vlgmr.msra.gmra.mxu3 %vm352_vm1, %v629_v25 }
 0x1b8   : > { %v927_v36 = vpop.permute.xlu1 %926 }
 0x1bd   : > { %968 = vmatmul.f32.gmra.mxu0 %v632_v26  ;;  %1794 = vmatmul.msk.f32.gmra.mxu1 %vm352_vm1, %v631_v27 }
 0x1be   : > { %1026 = vmatmul.f32.gmra.mxu2 %v632_v26  ;;  %1798 = vmatmul.msk.f32.gmra.mxu3 %vm352_vm1, %v631_v27 }
 0x1c0   : > { %v917_v38 = vpop.permute.xlu1 %916 }
 0x1c5   : > { %1795 = vmatmul.msk.f32.gmra.mxu1 %vm352_vm1, %v633_v28  ;;  %971 = vmatmul.f32.gmra.mxu0 %v634_v33 }
 0x1c6   : > { %1799 = vmatmul.msk.f32.gmra.mxu3 %vm352_vm1, %v633_v28  ;;  %1029 = vmatmul.f32.gmra.mxu2 %v634_v33 }
 0x1cd   : > { %1796 = vmatmul.msk.f32.gmra.mxu1 %vm352_vm1, %v635_v35 }
 0x1ce   : > { %1800 = vmatmul.msk.f32.gmra.mxu3 %vm352_vm1, %v635_v35 }
 0x204   : > { %v932_v16 = vpop.permute.xlu0 %931 }
 0x22a   : > { %v963_v37 = vpop.f32.mrf.mxu0 }
 0x22b   : > { %v964_v30 = vadd.f32 %v963_v37, %v917_v38 }
 0x230   : > { %v1021_v44 = vpop.f32.mrf.mxu2 }
 0x231   : > { %v1022_v47 = vadd.f32 %v1021_v44, %v917_v38 }
 0x232   : > { %v992_v39 = vpop.f32.mrf.mxu1  ;;  %v966_v50 = vpop.f32.mrf.mxu0 }
 0x233   : > { %v993_v42 = vadd.f32 %v992_v39, %v964_v30  ;;  %v967_v59 = vadd.f32 %v966_v50, %v922_v51 }
 0x235   : > { %v2280_v34 = vmax.f32 %v993_v42, 0.0 }
 0x237   : > { %2755 = vst [vmem:[#allocation8_spill] sm:$0xff] %v2280_v34  ;;  %1305 = vrot.lane.b32.xlu1 %v2280_v34, %s1866_s19  ;;  %1357 = vrot.lane.b32.xlu0 %v2280_v34, %s1869_s20 }
 0x238   : > { %1409 = vrot.lane.b32.xlu2 %v2280_v34, %s1871_s22 }
 0x239   : > { %v1050_v46 = vpop.f32.mrf.mxu3  ;;  %v1024_v2 = vpop.f32.mrf.mxu2 }
 0x23a   : > { %v1051_v48 = vadd.f32 %v1050_v46, %v1022_v47  ;;  %v995_v56 = vpop.f32.mrf.mxu1  ;;  %v1025_v13 = vadd.f32 %v1024_v2, %v922_v51  ;;  %v969_v4 = vpop.f32.mrf.mxu0 }
 0x23b   : > { %v996_v52 = vadd.f32 %v995_v56, %v967_v59  ;;  %v970_v8 = vadd.f32 %v969_v4, %v927_v36 }
 0x23c   : > { %v2294_v49 = vmax.f32 %v1051_v48, 0.0 }
 0x23d   : > { %v2308_v32 = vmax.f32 %v996_v52, 0.0 }
 0x23e   : > { %2756 = vst [vmem:[#allocation9_spill] sm:$0xff] %v2294_v49 }
 0x23f   : > { %1145 = vrot.lane.b32.xlu1 %v2280_v34, %s1862_s12  ;;  %1197 = vrot.lane.b32.xlu0 %v2280_v34, %s1861_s11  ;;  %2757 = vst [vmem:[#allocation10_spill] sm:$0xff] %v2308_v32 }
 0x240   : > { %1249 = vrot.lane.b32.xlu2 %v2280_v34, %s1864_s16 }
 0x241   : > { %v1053_v60 = vpop.f32.mrf.mxu3  ;;  %v1027_v9 = vpop.f32.mrf.mxu2 }
 0x242   : > { %v1054_v3 = vadd.f32 %v1053_v60, %v1025_v13  ;;  %v998_v7 = vpop.f32.mrf.mxu1  ;;  %v1028_v11 = vadd.f32 %v1027_v9, %v927_v36  ;;  %v972_v17 = vpop.f32.mrf.mxu0 }
 0x243   : > { %v999_v53 = vadd.f32 %v998_v7, %v970_v8  ;;  %v973_v18 = vadd.f32 %v972_v17, %v932_v16 }
 0x244   : > { %v2316_v54 = vmax.f32 %v1054_v3, 0.0 }
 0x245   : > { %v2330_v0 = vmax.f32 %v999_v53, 0.0 }
 0x246   : > { %2758 = vst [vmem:[#allocation11_spill] sm:$0xff] %v2316_v54 }
 0x247   : > { %1237 = vrot.lane.b32.xlu1 %v2294_v49, %s1864_s16  ;;  %1411 = vrot.lane.b32.xlu0 %v2294_v49, %s1871_s22  ;;  %2759 = vst [vmem:[#allocation12_spill] sm:$0xff] %v2330_v0 }
 0x248   : > { %1185 = vrot.lane.b32.xlu2 %v2294_v49, %s1861_s11 }
 0x249   : > { %v1056_v45 = vpop.f32.mrf.mxu3  ;;  %v1030_v26 = vpop.f32.mrf.mxu2 }
 0x24a   : > { %v1057_v14 = vadd.f32 %v1056_v45, %v1028_v11  ;;  %v1001_v21 = vpop.f32.mrf.mxu1  ;;  %v1031_v28 = vadd.f32 %v1030_v26, %v932_v16 }
 0x24b   : > { %v1002_v22 = vadd.f32 %v1001_v21, %v973_v18 }
 0x24c   : > { %v2338_v15 = vmax.f32 %v1057_v14, 0.0 }
 0x24d   : > { %v2364_v24 = vmax.f32 %v1002_v22, 0.0 }
 0x24e   : > { %2760 = vst [vmem:[#allocation13_spill] sm:$0xff] %v2338_v15 }
 0x24f   : > { %1359 = vrot.lane.b32.xlu1 %v2294_v49, %s1869_s20  ;;  %1133 = vrot.lane.b32.xlu0 %v2294_v49, %s1862_s12 }
 0x250   : > { %1307 = vrot.lane.b32.xlu2 %v2294_v49, %s1866_s19 }
 0x251   : > { %v1059_v33 = vpop.f32.mrf.mxu3 }
 0x252   : > { %v1060_v35 = vadd.f32 %v1059_v33, %v1031_v28 }
 0x254   : > { %v2390_v42 = vmax.f32 %v1060_v35, 0.0 }
 0x256   : > { %2761 = vst [vmem:[#allocation14_spill] sm:$0xff] %v2390_v42 }
 0x257   : > { %1251 = vrot.lane.b32.xlu1 %v2308_v32, %s1864_s16  ;;  %1413 = vrot.lane.b32.xlu0 %v2308_v32, %s1871_s22 }
 0x258   : > { %1361 = vrot.lane.b32.xlu2 %v2308_v32, %s1869_s20 }
 0x25f   : > { %1415 = vrot.lane.b32.xlu1 %v2316_v54, %s1871_s22  ;;  %1309 = vrot.lane.b32.xlu0 %v2308_v32, %s1866_s19 }
 0x260   : > { %1199 = vrot.lane.b32.xlu2 %v2308_v32, %s1861_s11 }
 0x267   : > { %1187 = vrot.lane.b32.xlu1 %v2316_v54, %s1861_s11  ;;  %1239 = vrot.lane.b32.xlu0 %v2316_v54, %s1864_s16 }
 0x268   : > { %1147 = vrot.lane.b32.xlu2 %v2308_v32, %s1862_s12 }
 0x26f   : > { %1311 = vrot.lane.b32.xlu1 %v2316_v54, %s1866_s19  ;;  %1363 = vrot.lane.b32.xlu0 %v2316_v54, %s1869_s20 }
 0x270   : > { %1313 = vrot.lane.b32.xlu2 %v2330_v0, %s1866_s19 }
 0x277   : > { %1135 = vrot.lane.b32.xlu1 %v2316_v54, %s1862_s12  ;;  %1253 = vrot.lane.b32.xlu0 %v2330_v0, %s1864_s16 }
 0x278   : > { %1419 = vrot.lane.b32.xlu2 %v2338_v15, %s1871_s22 }
 0x27f   : > { %1417 = vrot.lane.b32.xlu1 %v2330_v0, %s1871_s22  ;;  %1149 = vrot.lane.b32.xlu0 %v2330_v0, %s1862_s12 }
 0x280   : > { %1241 = vrot.lane.b32.xlu2 %v2338_v15, %s1864_s16 }
 0x287   : > { %1365 = vrot.lane.b32.xlu1 %v2330_v0, %s1869_s20  ;;  %1189 = vrot.lane.b32.xlu0 %v2338_v15, %s1861_s11 }
 0x288   : > { %1367 = vrot.lane.b32.xlu2 %v2338_v15, %s1869_s20 }
 0x28f   : > { %1201 = vrot.lane.b32.xlu1 %v2330_v0, %s1861_s11  ;;  %1315 = vrot.lane.b32.xlu0 %v2338_v15, %s1866_s19 }
 0x290   : > { %1137 = vrot.lane.b32.xlu2 %v2338_v15, %s1862_s12 }
 0x292   : > { %v1410_v23 = vpop.permute.xlu2 %1409 }
 0x297   : > { %1317 = vrot.lane.b32.xlu1 %v2364_v24, %s1866_s19  ;;  %1369 = vrot.lane.b32.xlu0 %v2364_v24, %s1869_s20 }
 0x298   : > { %1421 = vrot.lane.b32.xlu2 %v2364_v24, %s1871_s22 }
 0x29a   : > { %v1250_v25 = vpop.permute.xlu2 %1249 }
 0x29f   : > { %1151 = vrot.lane.b32.xlu1 %v2364_v24, %s1862_s12  ;;  %1203 = vrot.lane.b32.xlu0 %v2364_v24, %s1861_s11 }
 0x2a0   : > { %1255 = vrot.lane.b32.xlu2 %v2364_v24, %s1864_s16 }
 0x2a2   : > { %v1186_v27 = vpop.permute.xlu2 %1185 }
 0x2a7   : > { %1473 = vrot.lane.b32.xlu1 %v2364_v24, %s1870_s21  ;;  %1099 = vrot.lane.b32.xlu0 %v2364_v24, %s1863_s13 }
 0x2a8   : > { %1469 = vrot.lane.b32.xlu2 %v2330_v0, %s1870_s21 }
 0x2a9   : > { %v1306_v36 = vpop.permute.xlu1 %1305  ;;  %v1358_v37 = vpop.permute.xlu0 %1357 }
 0x2aa   : > { %v1308_v38 = vpop.permute.xlu2 %1307 }
 0x2ab   : > { %v2385_v30 = vsel %vm482_vm4, %v1306_v36, %v1308_v38  ;;  %v2388_v39 = vsel %vm482_vm4, %v1308_v38, %v1306_v36 }
 0x2af   : > { %1243 = vrot.lane.b32.xlu1 %v2390_v42, %s1864_s16  ;;  %1423 = vrot.lane.b32.xlu0 %v2390_v42, %s1871_s22 }
 0x2b0   : > { %1095 = vrot.lane.b32.xlu2 %v2308_v32, %s1863_s13 }
 0x2b1   : > { %v1146_v44 = vpop.permute.xlu1 %1145  ;;  %v1198_v46 = vpop.permute.xlu0 %1197 }
 0x2b2   : > { %v2399_v47 = vsel %vm388_vm0, %v1198_v46, %v1186_v27  ;;  %v2402_v48 = vsel %vm388_vm0, %v1186_v27, %v1198_v46  ;;  %v1362_v50 = vpop.permute.xlu2 %1361 }
 0x2b7   : > { %1371 = vrot.lane.b32.xlu1 %v2390_v42, %s1869_s20  ;;  %1081 = vrot.lane.b32.xlu0 %v2338_v15, %s1863_s13 }
 0x2b8   : > { %1191 = vrot.lane.b32.xlu2 %v2390_v42, %s1861_s11 }
 0x2b9   : > { %v1238_v51 = vpop.permute.xlu1 %1237  ;;  %v1412_v56 = vpop.permute.xlu0 %1411 }
 0x2ba   : > { %v2411_v59 = vsel %vm422_vm3, %v1250_v25, %v1238_v51  ;;  %v2414_v52 = vsel %vm422_vm3, %v1238_v51, %v1250_v25  ;;  %v2417_v2 = vsel %vm550_vm6, %v1410_v23, %v1412_v56  ;;  %v2420_v60 = vsel %vm550_vm6, %v1412_v56, %v1410_v23  ;;  %v1200_v13 = vpop.permute.xlu2 %1199 }
 0x2bf   : > { %1097 = vrot.lane.b32.xlu1 %v2330_v0, %s1863_s13  ;;  %1471 = vrot.lane.b32.xlu0 %v2338_v15, %s1870_s21 }
 0x2c0   : > { %1319 = vrot.lane.b32.xlu2 %v2390_v42, %s1866_s19 }
 0x2c1   : > { %v1360_v3 = vpop.permute.xlu1 %1359  ;;  %v1134_v4 = vpop.permute.xlu0 %1133 }
 0x2c2   : > { %v2429_v7 = vsel %vm516_vm5, %v1358_v37, %v1360_v3  ;;  %v2432_v8 = vsel %vm516_vm5, %v1360_v3, %v1358_v37  ;;  %v2435_v53 = vsel %vm352_vm1, %v1146_v44, %v1134_v4  ;;  %v2438_v9 = vsel %vm352_vm1, %v1134_v4, %v1146_v44  ;;  %v1148_v45 = vpop.permute.xlu2 %1147  ;;  %v1072_v37 = vld [vmem:[%s2727_s7] sm:$0xf] }
 0x2c3   : > { %2762 = vst [vmem:[#allocation15_spill] sm:$0xff] %v2435_v53 }
 0x2c4   : > { %2763 = vst [vmem:[#allocation16_spill] sm:$0xff] %v2438_v9 }
 0x2c7   : > { %1079 = vrot.lane.b32.xlu1 %v2316_v54, %s1863_s13  ;;  %1139 = vrot.lane.b32.xlu0 %v2390_v42, %s1862_s12 }
 0x2c8   : > { %1077 = vrot.lane.b32.xlu2 %v2294_v49, %s1863_s13 }
 0x2c9   : > { %v1252_v11 = vpop.permute.xlu1 %1251  ;;  %v1414_v14 = vpop.permute.xlu0 %1413 }
 0x2ca   : > { %v2446_v16 = vpop.permute.xlu2 %1313 }
 0x2cf   : > { %1467 = vrot.lane.b32.xlu1 %v2316_v54, %s1870_s21  ;;  %1465 = vrot.lane.b32.xlu0 %v2308_v32, %s1870_s21 }
 0x2d0   : > { %1083 = vrot.lane.b32.xlu2 %v2390_v42, %s1863_s13 }
 0x2d1   : > { %v1416_v17 = vpop.permute.xlu1 %1415  ;;  %v1310_v18 = vpop.permute.xlu0 %1309 }
 0x2d2   : > { %v2455_v21 = vsel %vm550_vm6, %v1414_v14, %v1416_v17  ;;  %v2458_v22 = vsel %vm550_vm6, %v1416_v17, %v1414_v14  ;;  %v1420_v23 = vpop.permute.xlu2 %1419 }
 0x2d7   : > { %1461 = vrot.lane.b32.xlu1 %v2280_v34, %s1870_s21  ;;  %1093 = vrot.lane.b32.xlu0 %v2280_v34, %s1863_s13  ;;  %s1805_s13 = sshll.u32 %s2795_s28, 3 }
 0x2d8   : > { %1475 = vrot.lane.b32.xlu2 %v2390_v42, %s1870_s21  ;;  %s302_s20 = scalar_lea.vmem %s2728_s8, %s1805_s13 }
 0x2d9   : > { %v1188_v25 = vpop.permute.xlu1 %1187  ;;  %v1240_v26 = vpop.permute.xlu0 %1239 }
 0x2da   : > { %v2467_v27 = vsel %vm388_vm0, %v1200_v13, %v1188_v25  ;;  %v2470_v28 = vsel %vm388_vm0, %v1188_v25, %v1200_v13  ;;  %v2473_v33 = vsel %vm422_vm3, %v1252_v11, %v1240_v26  ;;  %v2476_v35 = vsel %vm422_vm3, %v1240_v26, %v1252_v11  ;;  %v1242_v36 = vpop.permute.xlu2 %1241 }
 0x2df   : > { %1587 = vperm.xlu0 %1848, %v1072_v37  }
 0x2e0   : > { %1463 = vrot.lane.b32.xlu2 %v2294_v49, %s1870_s21 }
 0x2e1   : > { %v1312_v38 = vpop.permute.xlu1 %1311  ;;  %v1364_v44 = vpop.permute.xlu0 %1363 }
 0x2e2   : > { %v2484_v46 = vsel %vm482_vm4, %v1310_v18, %v1312_v38  ;;  %v2487_v51 = vsel %vm482_vm4, %v1312_v38, %v1310_v18  ;;  %v2490_v56 = vsel %vm516_vm5, %v1362_v50, %v1364_v44  ;;  %v2493_v13 = vsel %vm516_vm5, %v1364_v44, %v1362_v50  ;;  %v2495_v3 = vpop.permute.xlu2 %1367 }
 0x2e9   : > { %v1136_v4 = vpop.permute.xlu1 %1135  ;;  %v1254_v11 = vpop.permute.xlu0 %1253 }
 0x2ea   : > { %v2498_v14 = vsel %vm352_vm1, %v1148_v45, %v1136_v4  ;;  %v2501_v17 = vsel %vm352_vm1, %v1136_v4, %v1148_v45  ;;  %v1138_v25 = vpop.permute.xlu2 %1137  ;;  %v1259_v32 = vsel %vm422_vm3, %v1254_v11, %v1242_v36 }
 0x2eb   : > { %2764 = vst [vmem:[#allocation17_spill] sm:$0xff] %v2498_v14 }
 0x2ec   : > { %2765 = vst [vmem:[#allocation18_spill] sm:$0xff] %v2501_v17  ;;  %v1271_v17 = vsel %vm422_vm3, %v1242_v36, %v1254_v11 }
 0x2f1   : > { %v1418_v26 = vpop.permute.xlu1 %1417  ;;  %v1150_v18 = vpop.permute.xlu0 %1149 }
 0x2f2   : > { %v2504_v37 = vsel %vm352_vm1, %v1150_v18, %v1138_v25  ;;  %v2507_v38 = vsel %vm352_vm1, %v1138_v25, %v1150_v18  ;;  %v1422_v50 = vpop.permute.xlu2 %1421  ;;  %v1443_v15 = vsel %vm550_vm6, %v1420_v23, %v1418_v26 }
 0x2f3   : > { %2766 = vst [vmem:[#allocation19_spill] sm:$0xff] %v2504_v37 }
 0x2f4   : > { %2767 = vst [vmem:[#allocation20_spill] sm:$0xff] %v2507_v38 }
 0x2f9   : > { %v1366_v44 = vpop.permute.xlu1 %1365  ;;  %v2509_v63 = vpop.permute.xlu0 %1189 }
 0x2fa   : > { %v1256_v58 = vpop.permute.xlu2 %1255 }
 0x301   : > { %v1202_v57 = vpop.permute.xlu1 %1201  ;;  %v2511_v49 = vpop.permute.xlu0 %1315 }
 0x302   : > { %v2513_v12 = vpop.permute.xlu2 %1469 }
 0x303   : > { %2768 = vst [vmem:[#allocation21_spill] sm:$0xff] %v2513_v12  ;;  %v1427_v12 = vsel %vm550_vm6, %v1418_v26, %v1420_v23  ;;  %v1273_v23 = vmul.f32 %v2414_v52, %v2168_v6  ;;  %v1277_v26 = vmul.f32 %v1271_v17, %v2168_v6 }
 0x309   : > { %v2515_v45 = vpop.permute.xlu1 %1317  ;;  %v1370_v4 = vpop.permute.xlu0 %1369 }
 0x30a   : > { %v2517_v53 = vpop.permute.xlu2 %1095 }
 0x30b   : > { %2769 = vst [vmem:[#allocation22_spill] sm:$0xff] %v2517_v53 }
 0x311   : > { %v2519_v34 = vpop.permute.xlu1 %1151  ;;  %v1204_v9 = vpop.permute.xlu0 %1203 }
 0x312   : > { %v1192_v25 = vpop.permute.xlu2 %1191 }
 0x313   : > { %v1220_v52 = vsel %vm388_vm0, %v1192_v25, %v1204_v9 }
 0x319   : > { %v2521_v18 = vpop.permute.xlu1 %1473  ;;  %v2523_v54 = vpop.permute.xlu0 %1099 }
 0x31a   : > { %2770 = vst [vmem:[#allocation23_spill] sm:$0xff] %v2521_v18  ;;  %v2525_v14 = vpop.permute.xlu2 %1319 }
 0x31b   : > { %2771 = vst [vmem:[#allocation24_spill] sm:$0xff] %v2523_v54 }
 0x321   : > { %v1244_v37 = vpop.permute.xlu1 %1243  ;;  %v1424_v53 = vpop.permute.xlu0 %1423 }
 0x322   : > { %v1260_v0 = vsel %vm422_vm3, %v1256_v58, %v1244_v37  ;;  %v1272_v38 = vsel %vm422_vm3, %v1244_v37, %v1256_v58  ;;  %v1428_v18 = vsel %vm550_vm6, %v1422_v50, %v1424_v53  ;;  %v1444_v54 = vsel %vm550_vm6, %v1424_v53, %v1422_v50 }
 0x323   : > { %v1279_v42 = vmul.f32 %v1272_v38, %v2168_v6  ;;  %v1451_v62 = vmul.f32 %v1428_v18, %v2116_v19  ;;  %v1280_v36 = vmul.f32 %v1260_v0, %v2171_v1  ;;  %v1452_v11 = vmul.f32 %v1444_v54, %v2119_v20 }
 0x324   : > { %v1449_v58 = vmul.f32 %v1427_v12, %v2116_v19  ;;  %v1445_v53 = vmul.f32 %v2417_v2, %v2116_v19  ;;  %v1278_v37 = vmul.f32 %v1259_v32, %v2171_v1  ;;  %v1450_v0 = vmul.f32 %v1443_v15, %v2119_v20  ;;  %v2556_v2 = vpop.permute.xlu2 %1077 }
 0x325   : > { %1603 = vmatpush.msrb.mxu1 %v1279_v42  ;;  %1623 = vmatpush.msrb.mxu3 %v1451_v62  ;;  %v1274_v54 = vmul.f32 %v2411_v59, %v2171_v1  ;;  %v1275_v62 = vmul.f32 %v2476_v35, %v2168_v6  ;;  %v1447_v12 = vmul.f32 %v2455_v21, %v2116_v19 }
 0x326   : > { %1663 = vmatpush.msrb.mxu0 %v1280_v36  ;;  %1683 = vmatpush.msrb.mxu2 %v1452_v11  ;;  %v1446_v42 = vmul.f32 %v2420_v60, %v2119_v20  ;;  %v1276_v32 = vmul.f32 %v2473_v33, %v2171_v1  ;;  %v1448_v15 = vmul.f32 %v2458_v22, %v2119_v20 }
 0x327   : > { %1604 = vmatpush.msrb.mxu1 %v1277_v26  ;;  %1624 = vmatpush.msrb.mxu3 %v1449_v58  ;;  %v1375_v6 = vsel %vm516_vm5, %v1366_v44, %v2495_v3  ;;  %v1391_v19 = vsel %vm516_vm5, %v2495_v3, %v1366_v44  ;;  %v1208_v59 = vsel %vm388_vm0, %v1204_v9, %v1192_v25 }
 0x328   : > { %1664 = vmatpush.msrb.mxu0 %v1278_v37  ;;  %1684 = vmatpush.msrb.mxu2 %v1450_v0  ;;  %v1219_v35 = vsel %vm388_vm0, %v2509_v63, %v1202_v57  ;;  %v1207_v22 = vsel %vm388_vm0, %v1202_v57, %v2509_v63  ;;  %v1227_v9 = vmul.f32 %v1220_v52, %v2182_v5 }
 0x329   : > { %v1372_v60 = vpop.permute.xlu1 %1371  ;;  %v2567_v21 = vpop.permute.xlu0 %1081  ;;  %1605 = vmatpush.msrb.mxu1 %v1275_v62  ;;  %1625 = vmatpush.msrb.mxu3 %v1447_v12  ;;  %v1228_v3 = vmul.f32 %v1208_v59, %v2185_v10  ;;  %v1225_v38 = vmul.f32 %v1219_v35, %v2182_v5  ;;  %v1397_v50 = vmul.f32 %v1375_v6, %v2126_v29  ;;  %v2773_v62 = vld [vmem:[#allocation14_spill] sm:$0xff] }
 0x32a   : > { %v1376_v1 = vsel %vm516_vm5, %v1370_v4, %v1372_v60  ;;  %v1392_v20 = vsel %vm516_vm5, %v1372_v60, %v1370_v4  ;;  %1665 = vmatpush.msrb.mxu0 %v1276_v32  ;;  %1685 = vmatpush.msrb.mxu2 %v1448_v15  ;;  %v1226_v57 = vmul.f32 %v1207_v22, %v2185_v10  ;;  %v2778_v15 = vld [vmem:[#allocation18_spill] sm:$0xff]  ;;  %v2780_v60 = vld [vmem:[#allocation23_spill] sm:$0xff] }
 0x32b   : > { %1606 = vmatpush.msrb.mxu1 %v1273_v23  ;;  %1626 = vmatpush.msrb.mxu3 %v1445_v53  ;;  %v1399_v33 = vmul.f32 %v1376_v1, %v2126_v29  ;;  %v1400_v17 = vmul.f32 %v1392_v20, %v2129_v31  ;;  %v1398_v63 = vmul.f32 %v1391_v19, %v2129_v31  ;;  %v2779_v19 = vld [vmem:[#allocation10_spill] sm:$0xff]  ;;  %v2781_v1 = vld [vmem:[#allocation17_spill] sm:$0xff]  ;;  %v2782_v22 = vld [vmem:[#allocation11_spill] sm:$0xff] }
 0x32c   : > { %1666 = vmatpush.msrb.mxu0 %v1274_v54  ;;  %1686 = vmatpush.msrb.mxu2 %v1446_v42  ;;  %v1223_v44 = vmul.f32 %v2470_v28, %v2182_v5  ;;  %v1395_v4 = vmul.f32 %v2490_v56, %v2126_v29  ;;  %v1224_v25 = vmul.f32 %v2467_v27, %v2185_v10  ;;  %v1084_v58 = vpop.permute.xlu2 %1083  ;;  %v2776_v42 = vld [vmem:[#allocation19_spill] sm:$0xff] }
 0x32d   : > { %1607 = vmatpush.msrb.mxu1 %v1227_v9  ;;  %1627 = vmatpush.msrb.mxu3 %v1399_v33  ;;  %v1324_v18 = vsel %vm482_vm4, %v2515_v45, %v2525_v14  ;;  %v1396_v28 = vmul.f32 %v2493_v13, %v2129_v31  ;;  %v1340_v56 = vsel %vm482_vm4, %v2525_v14, %v2515_v45  ;;  %v2783_v33 = vld [vmem:[#allocation24_spill] sm:$0xff] }
 0x32e   : > { %1667 = vmatpush.msrb.mxu0 %v1228_v3  ;;  %1687 = vmatpush.msrb.mxu2 %v1400_v17  ;;  %v1221_v27 = vmul.f32 %v2402_v48, %v2182_v5  ;;  %v1393_v23 = vmul.f32 %v2429_v7, %v2126_v29  ;;  %v1323_v26 = vsel %vm482_vm4, %v2446_v16, %v2511_v49 }
 0x32f   : > { %1608 = vmatpush.msrb.mxu1 %v1225_v38  ;;  %1628 = vmatpush.msrb.mxu3 %v1397_v50  ;;  %v1222_v13 = vmul.f32 %v2399_v47, %v2185_v10  ;;  %v1394_v53 = vmul.f32 %v2432_v8, %v2129_v31  ;;  %v1339_v14 = vsel %vm482_vm4, %v2511_v49, %v2446_v16 }
 0x330   : > { %1668 = vmatpush.msrb.mxu0 %v1226_v57  ;;  %1688 = vmatpush.msrb.mxu2 %v1398_v63  ;;  %v1347_v29 = vmul.f32 %v1324_v18, %v2144_v55  ;;  %v1348_v5 = vmul.f32 %v1340_v56, %v2147_v43  ;;  %v1345_v48 = vmul.f32 %v1323_v26, %v2144_v55  ;;  %v2784_v57 = vld [vmem:[#allocation16_spill] sm:$0xff] }
 0x331   : > { %v2592_v36 = vpop.permute.xlu1 %1097  ;;  %v2594_v11 = vpop.permute.xlu0 %1471  ;;  %1609 = vmatpush.msrb.mxu1 %v1223_v44  ;;  %1629 = vmatpush.msrb.mxu3 %v1395_v4  ;;  %v1346_v10 = vmul.f32 %v1339_v14, %v2147_v43  ;;  %v1343_v31 = vmul.f32 %v2484_v46, %v2144_v55  ;;  %v1344_v7 = vmul.f32 %v2487_v51, %v2147_v43  ;;  %v2785_v44 = vld [vmem:[#allocation21_spill] sm:$0xff] }
 0x332   : > { %1669 = vmatpush.msrb.mxu0 %v1224_v25  ;;  %1689 = vmatpush.msrb.mxu2 %v1396_v28  ;;  %v1341_v45 = vmul.f32 %v2385_v30, %v2144_v55  ;;  %v1342_v46 = vmul.f32 %v2388_v39, %v2147_v43  ;;  %v1295_v51 = vmul.f32 %v2364_v24, %v2158_v61  ;;  %v2774_v55 = vld [vmem:[#allocation20_spill] sm:$0xff]  ;;  %v2777_v24 = vld [vmem:[#allocation13_spill] sm:$0xff]  ;;  %v2787_v28 = vld [vmem:[#allocation15_spill] sm:$0xff] }
 0x333   : > { %1610 = vmatpush.msrb.mxu1 %v1221_v27  ;;  %1630 = vmatpush.msrb.mxu3 %v1393_v23  ;;  %v1173_v30 = vmul.f32 %v2774_v55, %v2200_v40  ;;  %v2775_v43 = vld [vmem:[#allocation12_spill] sm:$0xff]  ;;  %v1174_v52 = vmul.f32 %v2776_v42, %v2203_v41  ;;  %v1171_v6 = vmul.f32 %v2778_v15, %v2200_v40  ;;  %v2788_v23 = vld [vmem:[#allocation7_spill] sm:$0xff]  ;;  %v1595_v55 = vld.sshfl [vmem:[#allocation1] sm:$0xff pattern:$0x75316420] }
 0x334   : > { %1670 = vmatpush.msrb.mxu0 %v1222_v13  ;;  %1690 = vmatpush.msrb.mxu2 %v1394_v53  ;;  %v2635_v54 = vpop.permute.xlu2 %1475  ;;  %v1293_v39 = vmul.f32 %v2775_v43, %v2158_v61  ;;  %v1291_v59 = vmul.f32 %v2779_v19, %v2158_v61  ;;  %v1172_v20 = vmul.f32 %v2781_v1, %v2203_v41  ;;  %v2786_v25 = vld [vmem:[#allocation8_spill] sm:$0xff]  ;;  %v2793_v43 = vld [vmem:[#allocation6_spill] sm:$0xff] }
 0x335   : > { %1631 = vmatpush.msrb.mxu3 %v1347_v29  ;;  %v1496_v35 = vsel %vm584_vm7, %v2635_v54, %v2780_v60  ;;  %v1104_v3 = vsel %vm320_vm2, %v2783_v33, %v1084_v58  ;;  %v1116_v17 = vsel %vm320_vm2, %v1084_v58, %v2783_v33  ;;  %v1169_v63 = vmul.f32 %v2784_v57, %v2200_v40  ;;  %v1596_v29 = vld.sshfl [vmem:[#allocation1 + $0x8] sm:$0xff pattern:$0x75316420]  ;;  %v1597_v42 = vld.sshfl [vmem:[#allocation1 + $0x10] sm:$0xff pattern:$0x75316420] }
 0x336   : > { %1691 = vmatpush.msrb.mxu2 %v1348_v5  ;;  %v1495_v4 = vsel %vm584_vm7, %v2594_v11, %v2785_v44  ;;  %v1289_v18 = vmul.f32 %v2786_v25, %v2158_v61  ;;  %v1170_v56 = vmul.f32 %v2787_v28, %v2203_v41  ;;  %v1115_v27 = vsel %vm320_vm2, %v2567_v21, %v2592_v36  ;;  %v2790_v61 = vld [vmem:[#allocation4_spill] sm:$0xff] }
 0x337   : > { %1632 = vmatpush.msrb.mxu3 %v1345_v48  ;;  %v1504_v26 = vmul.f32 %v2788_v23, %v1496_v35  ;;  %v1103_v13 = vsel %vm320_vm2, %v2592_v36, %v2567_v21  ;;  %v1123_v53 = vmul.f32 %v1116_v17, %v2790_v61  ;;  %v1502_v5 = vmul.f32 %v2788_v23, %v1495_v4 }
 0x338   : > { %1692 = vmatpush.msrb.mxu2 %v1346_v10  ;;  %v2792_v10 = vld [vmem:[#allocation22_spill] sm:$0xff]  ;;  %v1121_v21 = vmul.f32 %v1115_v27, %v2790_v61 }
 0x339   : > { %v1080_v49 = vpop.permute.xlu1 %1079  ;;  %v1140_v47 = vpop.permute.xlu0 %1139  ;;  %1633 = vmatpush.msrb.mxu3 %v1343_v31 }
 0x33a   : > { %v1156_v8 = vsel %vm352_vm1, %v2519_v34, %v1140_v47  ;;  %v1168_v16 = vsel %vm352_vm1, %v1140_v47, %v2519_v34  ;;  %1693 = vmatpush.msrb.mxu2 %v1344_v7  ;;  %v2772_v34 = vld [vmem:[#allocation3_spill] sm:$0xff]  ;;  %v1102_v31 = vsel %vm320_vm2, %v2792_v10, %v1080_v49  ;;  %v1114_v47 = vsel %vm320_vm2, %v1080_v49, %v2792_v10 }
 0x33b   : > { %v1175_v37 = vmul.f32 %v1168_v16, %v2200_v40  ;;  %v1176_v0 = vmul.f32 %v1156_v8, %v2203_v41  ;;  %1634 = vmatpush.msrb.mxu3 %v1341_v45  ;;  %v1296_v12 = vmul.f32 %v2773_v62, %v2772_v34  ;;  %v1294_v32 = vmul.f32 %v2777_v24, %v2772_v34  ;;  %v2789_v40 = vld [vmem:[#allocation9_spill] sm:$0xff] }
 0x33c   : > { %1694 = vmatpush.msrb.mxu2 %v1342_v46  ;;  %v1292_v9 = vmul.f32 %v2782_v22, %v2772_v34  ;;  %v1290_v58 = vmul.f32 %v2789_v40, %v2772_v34  ;;  %v2791_v41 = vld [vmem:[#allocation5_spill] sm:$0xff]  ;;  %v1464_v7 = vpop.permute.xlu2 %1463  ;;  %v1119_v46 = vmul.f32 %v1114_v47, %v2790_v61 }
 0x33d   : > { %1611 = vmatpush.msrb.mxu1 %v1175_v37  ;;  %1635 = vmatpush.msrb.mxu3 %v1295_v51  ;;  %v1124_v14 = vmul.f32 %v1104_v3, %v2791_v41  ;;  %v1122_v36 = vmul.f32 %v1103_v13, %v2791_v41  ;;  %v1120_v49 = vmul.f32 %v1102_v31, %v2791_v41 }
 0x33e   : > { %1671 = vmatpush.msrb.mxu0 %v1176_v0  ;;  %1695 = vmatpush.msrb.mxu2 %v1296_v12  ;;  %v1480_v37 = vsel %vm584_vm7, %v2780_v60, %v2635_v54  ;;  %v1479_v54 = vsel %vm584_vm7, %v2785_v44, %v2594_v11 }
 0x33f   : > { %1612 = vmatpush.msrb.mxu1 %v1173_v30  ;;  %1636 = vmatpush.msrb.mxu3 %v1293_v39  ;;  %v1503_v39 = vmul.f32 %v2793_v43, %v1480_v37 }
 0x340   : > { %1672 = vmatpush.msrb.mxu0 %v1174_v52  ;;  %1696 = vmatpush.msrb.mxu2 %v1294_v32  ;;  %v1501_v52 = vmul.f32 %v2793_v43, %v1479_v54 }
 0x341   : > { %v1468_v38 = vpop.permute.xlu1 %1467  ;;  %v1466_v50 = vpop.permute.xlu0 %1465  ;;  %1613 = vmatpush.msrb.mxu1 %v1171_v6  ;;  %1637 = vmatpush.msrb.mxu3 %v1291_v59 }
 0x342   : > { %1673 = vmatpush.msrb.mxu0 %v1172_v20  ;;  %1697 = vmatpush.msrb.mxu2 %v1292_v9  ;;  %v1494_v48 = vsel %vm584_vm7, %v1468_v38, %v1466_v50 }
 0x343   : > { %1614 = vmatpush.msrb.mxu1 %v1169_v63  ;;  %1638 = vmatpush.msrb.mxu3 %v1289_v18  ;;  %v1500_v8 = vmul.f32 %v2788_v23, %v1494_v48 }
 0x344   : > { %1674 = vmatpush.msrb.mxu0 %v1170_v56  ;;  %1698 = vmatpush.msrb.mxu2 %v1290_v58 }
 0x345   : > { %1715 = vmatpush.msra.mxu3 %v1504_v26  ;;  %1615 = vmatpush.msrb.mxu1 %v1123_v53 }
 0x346   : > { %1675 = vmatpush.msrb.mxu0 %v1124_v14  ;;  %1639 = vmatmul.f32.vlgmr.msrb.gmra.mxu3 %v1596_v29 }
 0x347   : > { %1699 = vmatmul.f32.vlgmr.msrb.gmra.mxu2 %v1596_v29  ;;  %1716 = vmatpush.msra.mxu3 %v1502_v5 }
 0x348   : > { %1616 = vmatpush.msrb.mxu1 %v1121_v21  ;;  %1676 = vmatpush.msrb.mxu0 %v1122_v36 }
 0x349   : > { %v1462_v16 = vpop.permute.xlu1 %1461  ;;  %v1094_v45 = vpop.permute.xlu0 %1093  ;;  %1717 = vmatpush.msra.mxu3 %v1500_v8 }
 0x34a   : > { %v1493_v0 = vsel %vm584_vm7, %v1464_v7, %v1462_v16  ;;  %v1101_v51 = vsel %vm320_vm2, %v1094_v45, %v2556_v2  ;;  %v1113_v34 = vsel %vm320_vm2, %v2556_v2, %v1094_v45  ;;  %1617 = vmatpush.msrb.mxu1 %v1119_v46  ;;  %1677 = vmatpush.msrb.mxu0 %v1120_v49 }
 0x34b   : > { %v1498_v62 = vmul.f32 %v2788_v23, %v1493_v0  ;;  %v1117_v12 = vmul.f32 %v1113_v34, %v2790_v61  ;;  %v1118_v30 = vmul.f32 %v1101_v51, %v2791_v41  ;;  %v1478_v2 = vsel %vm584_vm7, %v1466_v50, %v1468_v38 }
 0x34c   : > { %v1477_v24 = vsel %vm584_vm7, %v1462_v16, %v1464_v7  ;;  %v1499_v11 = vmul.f32 %v2793_v43, %v1478_v2 }
 0x34d   : > { %1618 = vmatpush.msrb.mxu1 %v1117_v12  ;;  %1718 = vmatpush.msra.mxu3 %v1498_v62  ;;  %v1497_v32 = vmul.f32 %v2793_v43, %v1477_v24 }
 0x34e   : > { %1678 = vmatpush.msrb.mxu0 %v1118_v30  ;;  %1619 = vmatmul.f32.vlgmr.msrb.gmra.mxu1 %v1595_v55 }
 0x34f   : > { %1655 = vmatpush.msra.mxu1 %v1503_v39  ;;  %1679 = vmatmul.f32.vlgmr.msrb.gmra.mxu0 %v1595_v55 }
 0x350   : > { %1802 = vmatmul.msk.f32.vlgmr.msra.gmra.mxu3 %vm1600_vm8, %v1597_v42 }
 0x351   : > { %1656 = vmatpush.msra.mxu1 %v1501_v52  ;;  %v1588_v59 = vpop.permute.xlu0 %1587 }
 0x353   : > { %1657 = vmatpush.msra.mxu1 %v1499_v11 }
 0x355   : > { %1658 = vmatpush.msra.mxu1 %v1497_v32 }
 0x356   : > { %1801 = vmatmul.msk.f32.vlgmr.msra.gmra.mxu1 %vm1600_vm8, %v1597_v42 }
 0x3c9   : > { %v1640_v15 = vpop.f32.mrf.mxu3 }
 0x3ca   : > { %v1700_v1 = vpop.f32.mrf.mxu2 }
 0x3cb   : > { %v1620_v6 = vpop.f32.mrf.mxu1 }
 0x3cc   : > { %v1680_v19 = vpop.f32.mrf.mxu0  ;;  %v1621_v60 = vadd.f32 %v1620_v6, %v1588_v59 }
 0x3cd   : > { %v1681_v35 = vadd.f32 %v1680_v19, %v1588_v59 }
 0x3ce   : > { %v1641_v22 = vadd.f32 %v1640_v15, %v1621_v60 }
 0x3cf   : > { %v1701_v20 = vadd.f32 %v1700_v1, %v1681_v35 }
 0x3d3   : > { %v1720_v9 = vpop.f32.mrf.mxu3  ;;  %v1660_v33 = vpop.f32.mrf.mxu1 }
 0x3d4   : > { %v1721_v3 = vadd.f32 %v1720_v9, %v1701_v20  ;;  %v1661_v17 = vadd.f32 %v1660_v33, %v1641_v22 }
 0x3d6   : > { %v1725_v38 = vrot.slane %v1721_v3, 4 }
 0x3d8   : > { %v1727_v50 = vsel %vm1726_vm9, %v1661_v17, %v1725_v38 }
 0x3d9   : > { %1729 = vst [vmem:[%s302_s20] sm:$0xff] %v1727_v50 }
 0x3da PF: > { %s18_s27 = sadd.s32 1, %s1857_s27  }
 0x3db   : > { %p15_p4 = scmp.ge.s32.totalorder %s18_s27, 4  }
 0x3dd   :  { %17 = sbr.rel (!%p15_p4) target bundleno = 1 (0x1), region = 84 }

</bundles_post_ra>
